<compile_context>
chip_gen: v7x
topology: tpu7x:2x2x1
jax: 0.10.0
libtpu: 0.0.40
codegen_flags: <defaults>
</compile_context>

<pallas_src>
import functools

import jax
import jax.numpy as jnp
from jax import lax
from jax.experimental import pallas as pl
from jax.experimental.pallas import tpu as pltpu

LANE = 128


def _round_up(v, m):
    return (v + m - 1) // m * m


def _pad_to(a, shape):
    return jnp.pad(a, [(0, t - s) for s, t in zip(a.shape, shape)])


# --------------------------------------------------------------------------
# Fused kernel: spatial mean/std reduction + both 3-layer MLPs
# --------------------------------------------------------------------------
def _fused_kernel(x_ref,
                  w1m_ref, b1m_ref, w2m_ref, b2m_ref, w3m_ref, b3m_ref,
                  w1s_ref, b1s_ref, w2s_ref, b2s_ref, w3s_ref, b3s_ref,
                  mean_out_ref, std_out_ref,
                  mean_sc, m2_sc,
                  *, eps, S, TS):
    k = pl.program_id(1)

    @pl.when(k == 0)
    def _():
        mean_sc[...] = jnp.zeros_like(mean_sc)
        m2_sc[...] = jnp.zeros_like(m2_sc)

    x = x_ref[...]                                   # (TN, C, TS) f32

    if S % TS == 0:
        # All spatial tiles are full; no masking needed.
        n_k = jnp.float32(TS)
        m_k = jnp.sum(x, axis=-1) * (1.0 / TS)       # (TN, C) tile mean
        d = x - m_k[..., None]
        m2_k = jnp.sum(d * d, axis=-1)               # (TN, C) tile sum((x-m)^2)
    else:
        # Ragged last tile: mask out-of-range lanes.
        rem_i = jnp.minimum(TS, S - k * TS)          # valid elems in this tile
        n_k = rem_i.astype(jnp.float32)
        col = lax.broadcasted_iota(jnp.int32, x.shape, 2)
        valid = col < rem_i
        m_k = jnp.sum(jnp.where(valid, x, 0.0), axis=-1) / n_k
        d = jnp.where(valid, x - m_k[..., None], 0.0)
        m2_k = jnp.sum(d * d, axis=-1)

    # Chan-style merge of (mean, M2) — preserves two-pass numerics.
    n_prev = (k * TS).astype(jnp.float32)            # elems already merged
    n_new = n_prev + n_k
    delta = m_k - mean_sc[...]
    ratio = n_k / n_new
    mean_sc[...] = mean_sc[...] + delta * ratio
    m2_sc[...] = m2_sc[...] + m2_k + (delta * delta) * (n_prev * ratio)

    @pl.when(k == pl.num_programs(1) - 1)
    def _():
        mean = mean_sc[...]                          # (TN, C)
        # torch .var() default is unbiased (divide by S-1); S==1 gives inf/NaN
        # just like PyTorch (documented assumption: S > 1).
        std = jnp.sqrt(m2_sc[...] * (1.0 / (S - 1.0)) + eps)

        def mlp(v, w1, b1, w2, b2, w3, b3):
            h = jnp.dot(v, w1[...], preferred_element_type=jnp.float32) + b1[...]
            h = jnp.maximum(h, 0.0)
            h = jnp.dot(h, w2[...], preferred_element_type=jnp.float32) + b2[...]
            h = jnp.maximum(h, 0.0)
            return jnp.dot(h, w3[...], preferred_element_type=jnp.float32) + b3[...]

        y_mean = mlp(mean, w1m_ref, b1m_ref, w2m_ref, b2m_ref, w3m_ref, b3m_ref)
        y_std = mlp(std, w1s_ref, b1s_ref, w2s_ref, b2s_ref, w3s_ref, b3s_ref)
        mean_out_ref[...] = y_mean[:, None, :].astype(mean_out_ref.dtype)
        std_out_ref[...] = y_std[:, None, :].astype(std_out_ref.dtype)


def _choose_tiles(N, C, S, budget_bytes):
    """Pick (TN, TS) so the (TN, C, TS) f32 input block fits the VMEM budget."""
    bytes_per_n = C * S * 4
    if bytes_per_n <= budget_bytes:
        TS = S
        tn_cap = max(1, budget_bytes // bytes_per_n)
        if N >= 2:
            # Keep >= 2 parallel grid steps so v7x's 2 TensorCores both get work.
            tn_cap = min(tn_cap, max(1, N // 2))
        TN = int(min(N, tn_cap))
    else:
        TN = 1
        if S <= LANE:
            TS = S
        else:
            TS = int(max(LANE, (budget_bytes // (C * 4)) // LANE * LANE))
            TS = min(TS, S)
    return TN, TS


# --------------------------------------------------------------------------
# Full module forward
# --------------------------------------------------------------------------
def calc_mean_std_learnable_forward(x, mean_params, std_params, out_feat,
                                    eps=1e-5,
                                    vmem_block_budget=8 * 1024 * 1024):
    N, C, H, W = x.shape
    S = H * W
    x3 = x.reshape(N, C, S)

    TN, TS = _choose_tiles(N, C, S, vmem_block_budget)
    grid = (pl.cdiv(N, TN), pl.cdiv(S, TS))

    w1m, b1m, w2m, b2m, w3m, b3m = mean_params
    w1s, b1s, w2s, b2s, w3s, b3s = std_params
    in_c, mid = w1m.shape
    assert in_c == C
    out_c = w3m.shape[1]
    assert out_c == out_feat

    # Zero-pad hidden / output feature dims to the 128-lane width (exact math:
    # padded columns have zero weight & bias). in_c (K of first matmul) stays
    # unpadded so the activation stream is untouched.
    midp = _round_up(mid, LANE)
    outp = _round_up(out_feat, LANE)

    def pad_set(w1, b1, w2, b2, w3, b3):
        return (_pad_to(w1, (C, midp)), _pad_to(b1, (1, midp)),
                _pad_to(w2, (midp, midp)), _pad_to(b2, (1, midp)),
                _pad_to(w3, (midp, outp)), _pad_to(b3, (1, outp)))

    wm = pad_set(w1m, b1m, w2m, b2m, w3m, b3m)
    ws = pad_set(w1s, b1s, w2s, b2s, w3s, b3s)

    const2 = lambda i, k: (0, 0)
    w_specs = [pl.BlockSpec(a.shape, const2) for a in (wm + ws)]

    kern = functools.partial(_fused_kernel, eps=float(eps), S=S, TS=TS)

    out_mean_p, out_std_p = pl.pallas_call(
        kern,
        out_shape=(jax.ShapeDtypeStruct((N, 1, outp), x.dtype),
                   jax.ShapeDtypeStruct((N, 1, outp), x.dtype)),
        grid=grid,
        in_specs=[pl.BlockSpec((TN, C, TS), lambda i, k: (i, 0, k))] + w_specs,
        out_specs=(pl.BlockSpec((TN, 1, outp), lambda i, k: (i, 0, 0)),
                   pl.BlockSpec((TN, 1, outp), lambda i, k: (i, 0, 0))),
        scratch_shapes=[pltpu.VMEM((TN, C), jnp.float32),   # running mean
                        pltpu.VMEM((TN, C), jnp.float32)],  # running M2
        compiler_params=pltpu.CompilerParams(
            dimension_semantics=("parallel", "arbitrary"),
            vmem_limit_bytes=32 * 1024 * 1024),
    )(x3, *wm, *ws)

    x_mean = out_mean_p[:, 0, :out_feat].reshape(N, out_feat, 1, 1)
    x_std = out_std_p[:, 0, :out_feat].reshape(N, out_feat, 1, 1)
    return x_mean, x_std


# --------------------------------------------------------------------------
# Parameters (weights stored as (in_features, out_features), i.e. transpose of
# PyTorch nn.Linear.weight; biases as (1, out_features)).
# --------------------------------------------------------------------------
def init_mlp_params(key, in_channels, out_channels, mid_channels=64,
                    dtype=jnp.float32):
    ks = jax.random.split(key, 6)

    def lin(kw, kb, fan_in, fan_out):
        bound = float(fan_in) ** -0.5
        w = jax.random.uniform(kw, (fan_in, fan_out), dtype, -bound, bound)
        b = jax.random.uniform(kb, (1, fan_out), dtype, -bound, bound)
        return w, b

    w1, b1 = lin(ks[0], ks[1], in_channels, mid_channels)
    w2, b2 = lin(ks[2], ks[3], mid_channels, mid_channels)
    w3, b3 = lin(ks[4], ks[5], mid_channels, out_channels)
    return (w1, b1, w2, b2, w3, b3)


# --------------------------------------------------------------------------
# Pure-JAX reference
# --------------------------------------------------------------------------
def _mlp_ref(x, params):
    w1, b1, w2, b2, w3, b3 = params
    h = jnp.maximum(x @ w1 + b1, 0.0)
    h = jnp.maximum(h @ w2 + b2, 0.0)
    return h @ w3 + b3


def reference_forward(x, mean_params, std_params, out_feat, eps=1e-5):
    N, C = x.shape[:2]
    xf = x.reshape(N, C, -1)
    mean = xf.mean(axis=2)
    std = jnp.sqrt(xf.var(axis=2, ddof=1) + eps)
    x_std = _mlp_ref(std, std_params).reshape(N, out_feat, 1, 1)
    x_mean = _mlp_ref(mean, mean_params).reshape(N, out_feat, 1, 1)
    return x_mean, x_std


if __name__ == "__main__":
    key = jax.random.PRNGKey(0)
    k_x, k_pm, k_ps, k_x2 = jax.random.split(key, 4)

    N, C, H, W = 2, 16, 16, 16          # in_feat = C = 16
    out_feat = 8
    eps = 1e-5

    # Non-zero mean data to exercise the merge numerics.
    x = jax.random.normal(k_x, (N, C, H, W), dtype=jnp.float32) * 2.0 + 1.5
    mean_params = init_mlp_params(k_pm, C, out_feat, mid_channels=64)
    std_params = init_mlp_params(k_ps, C, out_feat, mid_channels=64)

    ref_mean, ref_std = reference_forward(x, mean_params, std_params,
                                          out_feat, eps)

    # 1) Default budget: full spatial extent per block, 2 parallel N steps.
    out_mean, out_std = calc_mean_std_learnable_forward(
        x, mean_params, std_params, out_feat, eps)
    jax.block_until_ready((out_mean, out_std))
    assert out_mean.shape == (N, out_feat, 1, 1)
    assert out_std.shape == (N, out_feat, 1, 1)
    assert jnp.allclose(out_mean, ref_mean, atol=1e-4, rtol=1e-4), "mean mismatch"
    assert jnp.allclose(out_std, ref_std, atol=1e-4, rtol=1e-4), "std mismatch"

    # 2) Tiny budget: forces multi-step spatial accumulation (S % TS == 0 path).
    out_mean2, out_std2 = calc_mean_std_learnable_forward(
        x, mean_params, std_params, out_feat, eps,
        vmem_block_budget=16 * 1024)
    jax.block_until_ready((out_mean2, out_std2))
    assert jnp.allclose(out_mean2, ref_mean, atol=1e-4, rtol=1e-4), "tiled mean mismatch"
    assert jnp.allclose(out_std2, ref_std, atol=1e-4, rtol=1e-4), "tiled std mismatch"

    # 3) Ragged spatial tail (S not a multiple of TS) exercising the mask path.
    x3 = jax.random.normal(k_x2, (N, C, 16, 15), dtype=jnp.float32) + 0.7
    ref_mean3, ref_std3 = reference_forward(x3, mean_params, std_params,
                                            out_feat, eps)
    out_mean3, out_std3 = calc_mean_std_learnable_forward(
        x3, mean_params, std_params, out_feat, eps,
        vmem_block_budget=8 * 1024)
    jax.block_until_ready((out_mean3, out_std3))
    assert jnp.allclose(out_mean3, ref_mean3, atol=1e-4, rtol=1e-4), "ragged mean mismatch"
    assert jnp.allclose(out_std3, ref_std3, atol=1e-4, rtol=1e-4), "ragged std mismatch"

    print("KERNEL_OK")
</pallas_src>

<mosaic_0001>
module attributes {stable_mosaic.version = 11 : i64} {
  func.func @_fused_kernel(%arg0: i32, %arg1: i32, %arg2: memref<1x16x256xf32, #tpu.memory_space<vmem>>, %arg3: memref<16x128xf32, #tpu.memory_space<vmem>>, %arg4: memref<1x128xf32, #tpu.memory_space<vmem>>, %arg5: memref<128x128xf32, #tpu.memory_space<vmem>>, %arg6: memref<1x128xf32, #tpu.memory_space<vmem>>, %arg7: memref<128x128xf32, #tpu.memory_space<vmem>>, %arg8: memref<1x128xf32, #tpu.memory_space<vmem>>, %arg9: memref<16x128xf32, #tpu.memory_space<vmem>>, %arg10: memref<1x128xf32, #tpu.memory_space<vmem>>, %arg11: memref<128x128xf32, #tpu.memory_space<vmem>>, %arg12: memref<1x128xf32, #tpu.memory_space<vmem>>, %arg13: memref<128x128xf32, #tpu.memory_space<vmem>>, %arg14: memref<1x128xf32, #tpu.memory_space<vmem>>, %arg15: memref<1x1x128xf32, #tpu.memory_space<vmem>>, %arg16: memref<1x1x128xf32, #tpu.memory_space<vmem>>, %arg17: memref<1x16xf32, #tpu.memory_space<vmem>>, %arg18: memref<1x16xf32, #tpu.memory_space<vmem>>) attributes {dimension_semantics = [#tpu.dimension_semantics<parallel>, #tpu.dimension_semantics<arbitrary>], iteration_bounds = array<i64: 2, 1>, scalar_prefetch = 0 : i64, scratch_operands = 2 : i64, tpu.core_type = #tpu.core_type<tc>, window_params = [{transform_indices = @transform_0, window_bounds = array<i64: 1, 16, 256>}, {pipeline_mode = #tpu.pipeline_mode<synchronous>, transform_indices = @transform_1, window_bounds = array<i64: 16, 128>}, {pipeline_mode = #tpu.pipeline_mode<synchronous>, transform_indices = @transform_2, window_bounds = array<i64: 1, 128>}, {pipeline_mode = #tpu.pipeline_mode<synchronous>, transform_indices = @transform_3, window_bounds = array<i64: 128, 128>}, {pipeline_mode = #tpu.pipeline_mode<synchronous>, transform_indices = @transform_4, window_bounds = array<i64: 1, 128>}, {pipeline_mode = #tpu.pipeline_mode<synchronous>, transform_indices = @transform_5, window_bounds = array<i64: 128, 128>}, {pipeline_mode = #tpu.pipeline_mode<synchronous>, transform_indices = @transform_6, window_bounds = array<i64: 1, 128>}, {pipeline_mode = #tpu.pipeline_mode<synchronous>, transform_indices = @transform_7, window_bounds = array<i64: 16, 128>}, {pipeline_mode = #tpu.pipeline_mode<synchronous>, transform_indices = @transform_8, window_bounds = array<i64: 1, 128>}, {pipeline_mode = #tpu.pipeline_mode<synchronous>, transform_indices = @transform_9, window_bounds = array<i64: 128, 128>}, {pipeline_mode = #tpu.pipeline_mode<synchronous>, transform_indices = @transform_10, window_bounds = array<i64: 1, 128>}, {pipeline_mode = #tpu.pipeline_mode<synchronous>, transform_indices = @transform_11, window_bounds = array<i64: 128, 128>}, {pipeline_mode = #tpu.pipeline_mode<synchronous>, transform_indices = @transform_12, window_bounds = array<i64: 1, 128>}, {transform_indices = @transform_13, window_bounds = array<i64: 1, 1, 128>}, {transform_indices = @transform_14, window_bounds = array<i64: 1, 1, 128>}]} {
    %c0_i32 = arith.constant 0 : i32
    %0 = arith.cmpi eq, %arg1, %c0_i32 : i32
    %1 = arith.extui %0 : i1 to i32
    %c0_i32_0 = arith.constant 0 : i32
    %2 = arith.cmpi ne, %1, %c0_i32_0 : i32
    scf.if %2 {
      %cst_19 = arith.constant 0.000000e+00 : f32
      %34 = vector.broadcast %cst_19 : f32 to vector<1x16xf32>
      %c0_20 = arith.constant 0 : index
      %c0_21 = arith.constant 0 : index
      %35 = vector.load %arg17[%c0_20, %c0_21] : memref<1x16xf32, #tpu.memory_space<vmem>>, vector<1x16xf32>
      tpu.vector_store %arg17[%c0_20, %c0_21], %34 {strides = array<i32>} : memref<1x16xf32, #tpu.memory_space<vmem>>, vector<1x16xf32>,
      %cst_22 = arith.constant 0.000000e+00 : f32
      %36 = vector.broadcast %cst_22 : f32 to vector<1x16xf32>
      %c0_23 = arith.constant 0 : index
      %c0_24 = arith.constant 0 : index
      %37 = vector.load %arg18[%c0_23, %c0_24] : memref<1x16xf32, #tpu.memory_space<vmem>>, vector<1x16xf32>
      tpu.vector_store %arg18[%c0_23, %c0_24], %36 {strides = array<i32>} : memref<1x16xf32, #tpu.memory_space<vmem>>, vector<1x16xf32>,
    } else {
    }
    %c0 = arith.constant 0 : index
    %c0_1 = arith.constant 0 : index
    %c0_2 = arith.constant 0 : index
    %3 = vector.load %arg2[%c0, %c0_1, %c0_2] : memref<1x16x256xf32, #tpu.memory_space<vmem>>, vector<1x16x256xf32>
    %cst = arith.constant dense<0.000000e+00> : vector<1x16xf32>
    %4 = vector.multi_reduction <add>, %3, %cst [2] : vector<1x16x256xf32> to vector<1x16xf32>
    %cst_3 = arith.constant 3.906250e-03 : f32
    %5 = vector.broadcast %cst_3 : f32 to vector<1x16xf32>
    %6 = arith.mulf %4, %5 : vector<1x16xf32>
    %7 = vector.shape_cast %6 : vector<1x16xf32> to vector<1x16x1xf32>
    %8 = vector.broadcast %7 : vector<1x16x1xf32> to vector<1x16x256xf32>
    %9 = arith.subf %3, %8 : vector<1x16x256xf32>
    %10 = arith.mulf %9, %9 : vector<1x16x256xf32>
    %cst_4 = arith.constant dense<0.000000e+00> : vector<1x16xf32>
    %11 = vector.multi_reduction <add>, %10, %cst_4 [2] : vector<1x16x256xf32> to vector<1x16xf32>
    %c256_i32 = arith.constant 256 : i32
    %12 = arith.muli %arg1, %c256_i32 : i32
    %13 = arith.sitofp %12 : i32 to f32
    %cst_5 = arith.constant 2.560000e+02 : f32
    %14 = arith.addf %13, %cst_5 : f32
    %c0_6 = arith.constant 0 : index
    %c0_7 = arith.constant 0 : index
    %15 = vector.load %arg17[%c0_6, %c0_7] : memref<1x16xf32, #tpu.memory_space<vmem>>, vector<1x16xf32>
    %16 = arith.subf %6, %15 : vector<1x16xf32>
    %cst_8 = arith.constant 2.560000e+02 : f32
    %17 = arith.divf %cst_8, %14 : f32
    %c0_9 = arith.constant 0 : index
    %c0_10 = arith.constant 0 : index
    %18 = vector.load %arg17[%c0_9, %c0_10] : memref<1x16xf32, #tpu.memory_space<vmem>>, vector<1x16xf32>
    %19 = vector.broadcast %17 : f32 to vector<1x16xf32>
    %20 = arith.mulf %16, %19 : vector<1x16xf32>
    %21 = arith.addf %18, %20 : vector<1x16xf32>
    %c0_11 = arith.constant 0 : index
    %c0_12 = arith.constant 0 : index
    %22 = vector.load %arg17[%c0_11, %c0_12] : memref<1x16xf32, #tpu.memory_space<vmem>>, vector<1x16xf32>
    tpu.vector_store %arg17[%c0_11, %c0_12], %21 {strides = array<i32>} : memref<1x16xf32, #tpu.memory_space<vmem>>, vector<1x16xf32>,
    %c0_13 = arith.constant 0 : index
    %c0_14 = arith.constant 0 : index
    %23 = vector.load %arg18[%c0_13, %c0_14] : memref<1x16xf32, #tpu.memory_space<vmem>>, vector<1x16xf32>
    %24 = arith.addf %23, %11 : vector<1x16xf32>
    %25 = arith.mulf %16, %16 : vector<1x16xf32>
    %26 = arith.mulf %13, %17 : f32
    %27 = vector.broadcast %26 : f32 to vector<1x16xf32>
    %28 = arith.mulf %25, %27 : vector<1x16xf32>
    %29 = arith.addf %24, %28 : vector<1x16xf32>
    %c0_15 = arith.constant 0 : index
    %c0_16 = arith.constant 0 : index
    %30 = vector.load %arg18[%c0_15, %c0_16] : memref<1x16xf32, #tpu.memory_space<vmem>>, vector<1x16xf32>
    tpu.vector_store %arg18[%c0_15, %c0_16], %29 {strides = array<i32>} : memref<1x16xf32, #tpu.memory_space<vmem>>, vector<1x16xf32>,
    %c0_i32_17 = arith.constant 0 : i32
    %31 = arith.cmpi eq, %arg1, %c0_i32_17 : i32
    %32 = arith.extui %31 : i1 to i32
    %c0_i32_18 = arith.constant 0 : i32
    %33 = arith.cmpi ne, %32, %c0_i32_18 : i32
    scf.if %33 {
      %c0_19 = arith.constant 0 : index
      %c0_20 = arith.constant 0 : index
      %34 = vector.load %arg17[%c0_19, %c0_20] : memref<1x16xf32, #tpu.memory_space<vmem>>, vector<1x16xf32>
      %c0_21 = arith.constant 0 : index
      %c0_22 = arith.constant 0 : index
      %35 = vector.load %arg18[%c0_21, %c0_22] : memref<1x16xf32, #tpu.memory_space<vmem>>, vector<1x16xf32>
      %cst_23 = arith.constant 0.00392156886 : f32
      %36 = vector.broadcast %cst_23 : f32 to vector<1x16xf32>
      %37 = arith.mulf %35, %36 : vector<1x16xf32>
      %cst_24 = arith.constant 9.99999974E-6 : f32
      %38 = vector.broadcast %cst_24 : f32 to vector<1x16xf32>
      %39 = arith.addf %37, %38 : vector<1x16xf32>
      %40 = math.sqrt %39 : vector<1x16xf32>
      %c0_25 = arith.constant 0 : index
      %c0_26 = arith.constant 0 : index
      %41 = vector.load %arg3[%c0_25, %c0_26] : memref<16x128xf32, #tpu.memory_space<vmem>>, vector<16x128xf32>
      %cst_27 = arith.constant dense<0.000000e+00> : vector<1x128xf32>
      %42 = tpu.matmul %34, %41, %cst_27 {dimension_numbers = #tpu.dot_dimension_numbers<[1], [0], [0], [1], [0, 0, 1, 1], [], []>} : vector<1x16xf32>, vector<16x128xf32>, vector<1x128xf32> -> vector<1x128xf32>
      %c0_28 = arith.constant 0 : index
      %c0_29 = arith.constant 0 : index
      %43 = vector.load %arg4[%c0_28, %c0_29] : memref<1x128xf32, #tpu.memory_space<vmem>>, vector<1x128xf32>
      %44 = arith.addf %42, %43 : vector<1x128xf32>
      %cst_30 = arith.constant 0.000000e+00 : f32
      %45 = vector.broadcast %cst_30 : f32 to vector<1x128xf32>
      %46 = arith.maximumf %44, %45 : vector<1x128xf32>
      %c0_31 = arith.constant 0 : index
      %c0_32 = arith.constant 0 : index
      %47 = vector.load %arg5[%c0_31, %c0_32] : memref<128x128xf32, #tpu.memory_space<vmem>>, vector<128x128xf32>
      %cst_33 = arith.constant dense<0.000000e+00> : vector<1x128xf32>
      %48 = tpu.matmul %46, %47, %cst_33 {dimension_numbers = #tpu.dot_dimension_numbers<[1], [0], [0], [1], [0, 0, 1, 1], [], []>} : vector<1x128xf32>, vector<128x128xf32>, vector<1x128xf32> -> vector<1x128xf32>
      %c0_34 = arith.constant 0 : index
      %c0_35 = arith.constant 0 : index
      %49 = vector.load %arg6[%c0_34, %c0_35] : memref<1x128xf32, #tpu.memory_space<vmem>>, vector<1x128xf32>
      %50 = arith.addf %48, %49 : vector<1x128xf32>
      %cst_36 = arith.constant 0.000000e+00 : f32
      %51 = vector.broadcast %cst_36 : f32 to vector<1x128xf32>
      %52 = arith.maximumf %50, %51 : vector<1x128xf32>
      %c0_37 = arith.constant 0 : index
      %c0_38 = arith.constant 0 : index
      %53 = vector.load %arg7[%c0_37, %c0_38] : memref<128x128xf32, #tpu.memory_space<vmem>>, vector<128x128xf32>
      %cst_39 = arith.constant dense<0.000000e+00> : vector<1x128xf32>
      %54 = tpu.matmul %52, %53, %cst_39 {dimension_numbers = #tpu.dot_dimension_numbers<[1], [0], [0], [1], [0, 0, 1, 1], [], []>} : vector<1x128xf32>, vector<128x128xf32>, vector<1x128xf32> -> vector<1x128xf32>
      %c0_40 = arith.constant 0 : index
      %c0_41 = arith.constant 0 : index
      %55 = vector.load %arg8[%c0_40, %c0_41] : memref<1x128xf32, #tpu.memory_space<vmem>>, vector<1x128xf32>
      %56 = arith.addf %54, %55 : vector<1x128xf32>
      %c0_42 = arith.constant 0 : index
      %c0_43 = arith.constant 0 : index
      %57 = vector.load %arg9[%c0_42, %c0_43] : memref<16x128xf32, #tpu.memory_space<vmem>>, vector<16x128xf32>
      %cst_44 = arith.constant dense<0.000000e+00> : vector<1x128xf32>
      %58 = tpu.matmul %40, %57, %cst_44 {dimension_numbers = #tpu.dot_dimension_numbers<[1], [0], [0], [1], [0, 0, 1, 1], [], []>} : vector<1x16xf32>, vector<16x128xf32>, vector<1x128xf32> -> vector<1x128xf32>
      %c0_45 = arith.constant 0 : index
      %c0_46 = arith.constant 0 : index
      %59 = vector.load %arg10[%c0_45, %c0_46] : memref<1x128xf32, #tpu.memory_space<vmem>>, vector<1x128xf32>
      %60 = arith.addf %58, %59 : vector<1x128xf32>
      %cst_47 = arith.constant 0.000000e+00 : f32
      %61 = vector.broadcast %cst_47 : f32 to vector<1x128xf32>
      %62 = arith.maximumf %60, %61 : vector<1x128xf32>
      %c0_48 = arith.constant 0 : index
      %c0_49 = arith.constant 0 : index
      %63 = vector.load %arg11[%c0_48, %c0_49] : memref<128x128xf32, #tpu.memory_space<vmem>>, vector<128x128xf32>
      %cst_50 = arith.constant dense<0.000000e+00> : vector<1x128xf32>
      %64 = tpu.matmul %62, %63, %cst_50 {dimension_numbers = #tpu.dot_dimension_numbers<[1], [0], [0], [1], [0, 0, 1, 1], [], []>} : vector<1x128xf32>, vector<128x128xf32>, vector<1x128xf32> -> vector<1x128xf32>
      %c0_51 = arith.constant 0 : index
      %c0_52 = arith.constant 0 : index
      %65 = vector.load %arg12[%c0_51, %c0_52] : memref<1x128xf32, #tpu.memory_space<vmem>>, vector<1x128xf32>
      %66 = arith.addf %64, %65 : vector<1x128xf32>
      %cst_53 = arith.constant 0.000000e+00 : f32
      %67 = vector.broadcast %cst_53 : f32 to vector<1x128xf32>
      %68 = arith.maximumf %66, %67 : vector<1x128xf32>
      %c0_54 = arith.constant 0 : index
      %c0_55 = arith.constant 0 : index
      %69 = vector.load %arg13[%c0_54, %c0_55] : memref<128x128xf32, #tpu.memory_space<vmem>>, vector<128x128xf32>
      %cst_56 = arith.constant dense<0.000000e+00> : vector<1x128xf32>
      %70 = tpu.matmul %68, %69, %cst_56 {dimension_numbers = #tpu.dot_dimension_numbers<[1], [0], [0], [1], [0, 0, 1, 1], [], []>} : vector<1x128xf32>, vector<128x128xf32>, vector<1x128xf32> -> vector<1x128xf32>
      %c0_57 = arith.constant 0 : index
      %c0_58 = arith.constant 0 : index
      %71 = vector.load %arg14[%c0_57, %c0_58] : memref<1x128xf32, #tpu.memory_space<vmem>>, vector<1x128xf32>
      %72 = arith.addf %70, %71 : vector<1x128xf32>
      %73 = vector.shape_cast %56 : vector<1x128xf32> to vector<1x1x128xf32>
      %c0_59 = arith.constant 0 : index
      %c0_60 = arith.constant 0 : index
      %c0_61 = arith.constant 0 : index
      %74 = vector.load %arg15[%c0_59, %c0_60, %c0_61] : memref<1x1x128xf32, #tpu.memory_space<vmem>>, vector<1x1x128xf32>
      tpu.vector_store %arg15[%c0_59, %c0_60, %c0_61], %73 {strides = array<i32>} : memref<1x1x128xf32, #tpu.memory_space<vmem>>, vector<1x1x128xf32>,
      %75 = vector.shape_cast %72 : vector<1x128xf32> to vector<1x1x128xf32>
      %c0_62 = arith.constant 0 : index
      %c0_63 = arith.constant 0 : index
      %c0_64 = arith.constant 0 : index
      %76 = vector.load %arg16[%c0_62, %c0_63, %c0_64] : memref<1x1x128xf32, #tpu.memory_space<vmem>>, vector<1x1x128xf32>
      tpu.vector_store %arg16[%c0_62, %c0_63, %c0_64], %75 {strides = array<i32>} : memref<1x1x128xf32, #tpu.memory_space<vmem>>, vector<1x1x128xf32>,
    } else {
    }
    return
  }
  func.func @transform_0(%arg0: i32, %arg1: i32) -> (i32, i32, i32) {
    %c0_i32 = arith.constant 0 : i32
    %c0_i32_0 = arith.constant 0 : i32
    return %arg0, %c0_i32, %arg1 : i32, i32, i32
  }
  func.func @transform_1(%arg0: i32, %arg1: i32) -> (i32, i32) {
    %c0_i32 = arith.constant 0 : i32
    %c0_i32_0 = arith.constant 0 : i32
    %c0_i32_1 = arith.constant 0 : i32
    return %c0_i32, %c0_i32_0 : i32, i32
  }
  func.func @transform_2(%arg0: i32, %arg1: i32) -> (i32, i32) {
    %c0_i32 = arith.constant 0 : i32
    %c0_i32_0 = arith.constant 0 : i32
    %c0_i32_1 = arith.constant 0 : i32
    return %c0_i32, %c0_i32_0 : i32, i32
  }
  func.func @transform_3(%arg0: i32, %arg1: i32) -> (i32, i32) {
    %c0_i32 = arith.constant 0 : i32
    %c0_i32_0 = arith.constant 0 : i32
    %c0_i32_1 = arith.constant 0 : i32
    return %c0_i32, %c0_i32_0 : i32, i32
  }
  func.func @transform_4(%arg0: i32, %arg1: i32) -> (i32, i32) {
    %c0_i32 = arith.constant 0 : i32
    %c0_i32_0 = arith.constant 0 : i32
    %c0_i32_1 = arith.constant 0 : i32
    return %c0_i32, %c0_i32_0 : i32, i32
  }
  func.func @transform_5(%arg0: i32, %arg1: i32) -> (i32, i32) {
    %c0_i32 = arith.constant 0 : i32
    %c0_i32_0 = arith.constant 0 : i32
    %c0_i32_1 = arith.constant 0 : i32
    return %c0_i32, %c0_i32_0 : i32, i32
  }
  func.func @transform_6(%arg0: i32, %arg1: i32) -> (i32, i32) {
    %c0_i32 = arith.constant 0 : i32
    %c0_i32_0 = arith.constant 0 : i32
    %c0_i32_1 = arith.constant 0 : i32
    return %c0_i32, %c0_i32_0 : i32, i32
  }
  func.func @transform_7(%arg0: i32, %arg1: i32) -> (i32, i32) {
    %c0_i32 = arith.constant 0 : i32
    %c0_i32_0 = arith.constant 0 : i32
    %c0_i32_1 = arith.constant 0 : i32
    return %c0_i32, %c0_i32_0 : i32, i32
  }
  func.func @transform_8(%arg0: i32, %arg1: i32) -> (i32, i32) {
    %c0_i32 = arith.constant 0 : i32
    %c0_i32_0 = arith.constant 0 : i32
    %c0_i32_1 = arith.constant 0 : i32
    return %c0_i32, %c0_i32_0 : i32, i32
  }
  func.func @transform_9(%arg0: i32, %arg1: i32) -> (i32, i32) {
    %c0_i32 = arith.constant 0 : i32
    %c0_i32_0 = arith.constant 0 : i32
    %c0_i32_1 = arith.constant 0 : i32
    return %c0_i32, %c0_i32_0 : i32, i32
  }
  func.func @transform_10(%arg0: i32, %arg1: i32) -> (i32, i32) {
    %c0_i32 = arith.constant 0 : i32
    %c0_i32_0 = arith.constant 0 : i32
    %c0_i32_1 = arith.constant 0 : i32
    return %c0_i32, %c0_i32_0 : i32, i32
  }
  func.func @transform_11(%arg0: i32, %arg1: i32) -> (i32, i32) {
    %c0_i32 = arith.constant 0 : i32
    %c0_i32_0 = arith.constant 0 : i32
    %c0_i32_1 = arith.constant 0 : i32
    return %c0_i32, %c0_i32_0 : i32, i32
  }
  func.func @transform_12(%arg0: i32, %arg1: i32) -> (i32, i32) {
    %c0_i32 = arith.constant 0 : i32
    %c0_i32_0 = arith.constant 0 : i32
    %c0_i32_1 = arith.constant 0 : i32
    return %c0_i32, %c0_i32_0 : i32, i32
  }
  func.func @transform_13(%arg0: i32, %arg1: i32) -> (i32, i32, i32) {
    %c0_i32 = arith.constant 0 : i32
    %c0_i32_0 = arith.constant 0 : i32
    %c0_i32_1 = arith.constant 0 : i32
    return %arg0, %c0_i32, %c0_i32_0 : i32, i32, i32
  }
  func.func @transform_14(%arg0: i32, %arg1: i32) -> (i32, i32, i32) {
    %c0_i32 = arith.constant 0 : i32
    %c0_i32_0 = arith.constant 0 : i32
    %c0_i32_1 = arith.constant 0 : i32
    return %arg0, %c0_i32, %c0_i32_0 : i32, i32, i32
  }
}

</mosaic_0001>

<bundles_post_ra>
// kernel: tpu_custom_call.1
= control target key start
LH: loop header
LB: loop body
LE: loop exit
PB: predicated region body
PF: predicated region fallthrough
CT: control target
= control target key end

     0   :  { %s3488_s0 = inlined_call_operand.hbm [shape: f32[2,16,256], index: 0, kind: input, shape index: {}]   ;;  %s3489_s1 = inlined_call_operand.hbm [shape: f32[16,128], index: 1, kind: input, shape index: {}]   ;;  %s3490_s2 = inlined_call_operand.vmem [shape: f32[1,128], index: 2, kind: input, shape index: {}]   ;;  %s3491_s3 = inlined_call_operand.hbm [shape: f32[128,128], index: 3, kind: input, shape index: {}]   ;;  %s3492_s4 = inlined_call_operand.vmem [shape: f32[1,128], index: 4, kind: input, shape index: {}]   ;;  %s3493_s5 = inlined_call_operand.hbm [shape: f32[128,128], index: 5, kind: input, shape index: {}]   ;;  %s3494_s6 = inlined_call_operand.vmem [shape: f32[1,128], index: 6, kind: input, shape index: {}]   ;;  %s3495_s7 = inlined_call_operand.vmem [shape: f32[16,128], index: 7, kind: input, shape index: {}]   ;;  %s3496_s8 = inlined_call_operand.vmem [shape: f32[1,128], index: 8, kind: input, shape index: {}]   ;;  %s3497_s9 = inlined_call_operand.hbm [shape: f32[128,128], index: 9, kind: input, shape index: {}]   ;;  %s3498_s10 = inlined_call_operand.vmem [shape: f32[1,128], index: 10, kind: input, shape index: {}]   ;;  %s3499_s11 = inlined_call_operand.hbm [shape: f32[128,128], index: 11, kind: input, shape index: {}]   ;;  %s3500_s12 = inlined_call_operand.vmem [shape: f32[1,128], index: 12, kind: input, shape index: {}]   ;;  %s3501_s13 = inlined_call_operand.hbm [shape: f32[2,1,128], index: 13, kind: output, shape index: {0}]   ;;  %s3502_s14 = inlined_call_operand.hbm [shape: f32[2,1,128], index: 14, kind: output, shape index: {1}]  }
   0x1   :  { %3511 = sst [smem:[#allocation25_spill]] %s3488_s0 }
   0x2   :  { %3512 = sst [smem:[#allocation26_spill]] %s3489_s1 }
   0x3   :  { %3513 = sst [smem:[#allocation27_spill]] %s3492_s4 }
   0x4   :  { %3514 = sst [smem:[#allocation28_spill]] %s3494_s6 }
   0x5   :  { %3515 = sst [smem:[#allocation29_spill]] %s3496_s8 }
   0x6   :  { %3516 = sst [smem:[#allocation30_spill]] %s3498_s10 }
   0x7   :  { %3517 = sst [smem:[#allocation31_spill]] %s3500_s12 }
   0x8   :  { %3518 = sst [smem:[#allocation32_spill]] %s3501_s13 }
   0x9   :  { %3519 = sst [smem:[#allocation33_spill]] %s3502_s14 }
   0xa   :  { %20 = vsyncpa [#allocation5], 0 }
   0xb   :  { %22 = vsyncpa [#allocation5 + $0x1], 0 }
   0xc   :  { %23 = vsyncpa [#allocation8], 0 }
   0xd   :  { %24 = vsyncpa [#allocation11], 0 }
   0xe   :  { %25 = vsyncpa [#allocation14], 0 }
   0xf   :  { %26 = vsyncpa [#allocation6], 0 }
  0x10   :  { %28 = vsyncpa [#allocation6 + $0x1], 0 }
  0x11   :  { %29 = vsyncpa [#allocation17], 0 }
  0x12   :  { %31 = vsyncpa [#allocation17 + $0x1], 0  ;;  %s2901_s29 = smov 0   ;;  %s2903_s30 = smov 0  }
  0x13   :  { %s2905_s15 = smov 0   ;;  %s2907_s16 = smov 0  }
  0x14   :  { %s2909_s17 = smov 0   ;;  %s2911_s18 = smov 0  }
  0x15 LB: > { %3520 = sst [smem:[#allocation24_spill]] %s2799_s16  ;;  %s3503_s19 = sadd.s32 4294967295, %s2807_s18   ;;  %s2807_s18 = sphi %s2911_s18, %s37_s18   ;;  %s2803_s17 = sphi %s2909_s17, %s3551_s17   ;;  %s2799_s16 = sphi %s2907_s16, %s3550_s16   ;;  %s2795_s15 = sphi %s2905_s15, %s3549_s15   ;;  %s2791_s30 = sphi %s2903_s30, %s3548_s30   ;;  %s2787_s29 = sphi %s2901_s29, %s3547_s29  }
  0x16   : > { %p2018_p0 = scmp.ge.s32.totalorder %s2807_s18, 1  ;;  %p2935_p1 = scmp.eq.s32.totalorder %s3503_s19, 0 }
  0x17   : > { %p386_p2 = scmp.lt.s32.totalorder %s2807_s18, 3  ;;  %s2809_s22 = smov [#allocation7]  }
  0x18   : > { %s3521_s20 = scalar_select %p2935_p1, 1, 0 }
  0x19   : > { %p2940_p3 = pnand %p2018_p0, %p386_p2  ;;  %s398_s23 = sshll.u32 %s2809_s22, 4  ;;  %s2944_s23 = int_to_ptr.vmem [resolvable:$true] %s398_s23 }
  0x1a   : > { %s2810_s25 = smov [#allocation10]   ;;  %s2811_s27 = smov [#allocation9]  }
  0x1b   : > { %s3522_s21 = scalar_select %p2940_p3, 1, 0 }
  0x1c   : > { %p2406_p4 = pneg %p2940_p3  ;;  %s430_s26 = sshll.u32 %s2810_s25, 4  ;;  %s2955_s26 = int_to_ptr.vmem [resolvable:$true] %s430_s26 }
  0x1d   : > { %s2957_s28 = sshll.u32 %s2811_s27, 4  ;;  %s3524_s1 = sld [smem:[#allocation26_spill]]  ;;  %s415_s28 = int_to_ptr.vmem [resolvable:$true] %s2957_s28 }
  0x1e   : > { %p2951_p6 = pnand %p2406_p4, %p2935_p1 }
  0x20   : > { %p2967_p8 = pneg %p2951_p6 }
  0x23   : > { %s2511_s14 = scalar_lea.hbm %s3524_s1, 256 }
  0x24   : > { %p2512_p7 = scmp.ne.s32.totalorder %s3524_s1, %s2511_s14  ;;  %p2518_p11 = scmp.lt.u32.totalorder %s2511_s14, %s3524_s1 }
  0x26   : > { %p2514_p9 = pnand %p2967_p8, %p2512_p7 }
  0x28   : > { %p2515_p10 = pneg %p2514_p9 }
  0x2a   : > { %p2520_p12 = pnand %p2518_p11, %p2515_p10 }
  0x2c   : > { %2523 = shalt.err (!%p2520_p12)
}
  0x2d   : > { %s2524_s12 = scalar_lea.vmem %s2944_s23, 256  ;;  %p2532_p4 = scmp.lt.s32.totalorder %s2944_s23, %s2944_s23 }
  0x2e   : > { %p2525_p13 = scmp.ne.s32.totalorder %s2944_s23, %s2524_s12  ;;  %p2533_p5 = scmp.lt.s32.totalorder %s2524_s12, %s2524_s12 }
  0x30   : > { %p2527_p0 = pnand %p2525_p13, %p2967_p8  ;;  %p2534_p7 = por %p2533_p5, %p2532_p4 }
  0x32   : > { %p2528_p2 = pneg %p2527_p0 }
  0x34   : > { %p2535_p9 = pnand %p2534_p7, %p2528_p2 }
  0x36   : > { %2538 = shalt.err (!%p2535_p9)
}
  0x37   : > { %s2812_s13 = smov 128   ;;  %s2813_s14 = smov 8  }
  0x38   : > { %2409 = dma.hbm_to_vmem [thread:$0]  (!%p2951_p6), %s3524_s1, 256, %s2944_s23, [#allocation8], %s2812_s13, %s2812_s13, %s2813_s14  }
  0x39   : > { %s2539_s12 = scalar_lea.hbm %s3493_s5, 2048 }
  0x3a   : > { %p2540_p5 = scmp.ne.s32.totalorder %s3493_s5, %s2539_s12  ;;  %p2546_p12 = scmp.lt.u32.totalorder %s2539_s12, %s3493_s5 }
  0x3c   : > { %p2542_p10 = pnand %p2540_p5, %p2967_p8 }
  0x3e   : > { %p2543_p11 = pneg %p2542_p10 }
  0x40   : > { %p2548_p13 = pnand %p2546_p12, %p2543_p11 }
  0x42   : > { %2551 = shalt.err (!%p2548_p13)
}
  0x43   : > { %s2552_s23 = scalar_lea.vmem %s2955_s26, 2048  ;;  %p2560_p7 = scmp.lt.s32.totalorder %s2955_s26, %s2955_s26 }
  0x44   : > { %p2553_p0 = scmp.ne.s32.totalorder %s2955_s26, %s2552_s23  ;;  %p2561_p9 = scmp.lt.s32.totalorder %s2552_s23, %s2552_s23 }
  0x46   : > { %p2555_p2 = pnand %p2553_p0, %p2967_p8  ;;  %p2562_p5 = por %p2561_p9, %p2560_p7 }
  0x48   : > { %p2556_p4 = pneg %p2555_p2 }
  0x4a   : > { %p2563_p10 = pnand %p2562_p5, %p2556_p4 }
  0x4c   : > { %2566 = shalt.err (!%p2563_p10)
}
  0x4d   : > { %2415 = dma.hbm_to_vmem [thread:$0]  (!%p2951_p6), %s3493_s5, 2048, %s2955_s26, [#allocation11], %s2812_s13, %s2812_s13, %s2813_s14  }
  0x4e   : > { %s2567_s19 = scalar_lea.hbm %s3491_s3, 2048 }
  0x4f   : > { %p2568_p11 = scmp.ne.s32.totalorder %s3491_s3, %s2567_s19  ;;  %p2574_p0 = scmp.lt.u32.totalorder %s2567_s19, %s3491_s3 }
  0x51   : > { %p2570_p12 = pnand %p2568_p11, %p2967_p8 }
  0x53   : > { %p2571_p13 = pneg %p2570_p12 }
  0x55   : > { %p2576_p2 = pnand %p2574_p0, %p2571_p13 }
  0x57   : > { %2579 = shalt.err (!%p2576_p2)
}
  0x58   : > { %s2580_s23 = scalar_lea.vmem %s415_s28, 2048  ;;  %p2588_p5 = scmp.lt.s32.totalorder %s415_s28, %s415_s28 }
  0x59   : > { %p2581_p4 = scmp.ne.s32.totalorder %s415_s28, %s2580_s23  ;;  %p2589_p10 = scmp.lt.s32.totalorder %s2580_s23, %s2580_s23 }
  0x5b   : > { %p2583_p7 = pnand %p2581_p4, %p2967_p8  ;;  %p2590_p3 = por %p2589_p10, %p2588_p5 }
  0x5d   : > { %p2584_p9 = pneg %p2583_p7 }
  0x5f   : > { %p2591_p1 = pnand %p2590_p3, %p2584_p9 }
  0x61   : > { %2594 = shalt.err (!%p2591_p1)
}
  0x62   : > { %2412 = dma.hbm_to_vmem [thread:$0]  (!%p2951_p6), %s3491_s3, 2048, %s415_s28, [#allocation8], %s2812_s13, %s2812_s13, %s2813_s14  }
  0x63   : > { %s2814_s6 = smov [#allocation12]   ;;  %s2815_s16 = smov [#allocation13]  }
  0x64   : > { %s452_s8 = sshll.u32 %s2814_s6, 4  ;;  %s468_s19 = sshll.u32 %s2815_s16, 4  ;;  %s453_s8 = int_to_ptr.vmem [resolvable:$true] %s452_s8  ;;  %s469_s19 = int_to_ptr.vmem [resolvable:$true] %s468_s19 }
  0x65   : > { %s2595_s27 = scalar_lea.hbm %s3497_s9, 2048 }
  0x66   : > { %p2596_p1 = scmp.ne.s32.totalorder %s3497_s9, %s2595_s27  ;;  %p2602_p12 = scmp.lt.u32.totalorder %s2595_s27, %s3497_s9 }
  0x68   : > { %p2598_p3 = pnand %p2596_p1, %p2967_p8 }
  0x6a   : > { %p2599_p11 = pneg %p2598_p3 }
  0x6c   : > { %p2604_p13 = pnand %p2602_p12, %p2599_p11 }
  0x6e   : > { %2607 = shalt.err (!%p2604_p13)
}
  0x6f   : > { %s2608_s28 = scalar_lea.vmem %s453_s8, 2048  ;;  %p2616_p7 = scmp.lt.s32.totalorder %s453_s8, %s453_s8 }
  0x70   : > { %p2609_p0 = scmp.ne.s32.totalorder %s453_s8, %s2608_s28  ;;  %p2617_p9 = scmp.lt.s32.totalorder %s2608_s28, %s2608_s28 }
  0x72   : > { %p2611_p2 = pnand %p2609_p0, %p2967_p8  ;;  %p2618_p5 = por %p2617_p9, %p2616_p7 }
  0x74   : > { %p2612_p4 = pneg %p2611_p2 }
  0x76   : > { %p2619_p10 = pnand %p2618_p5, %p2612_p4 }
  0x78   : > { %2622 = shalt.err (!%p2619_p10)
}
  0x79   : > { %2418 = dma.hbm_to_vmem [thread:$0]  (!%p2951_p6), %s3497_s9, 2048, %s453_s8, [#allocation11], %s2812_s13, %s2812_s13, %s2813_s14  }
  0x7a   : > { %s2623_s22 = scalar_lea.hbm %s3499_s11, 2048 }
  0x7b   : > { %p2624_p1 = scmp.ne.s32.totalorder %s3499_s11, %s2623_s22  ;;  %p2630_p12 = scmp.lt.u32.totalorder %s2623_s22, %s3499_s11 }
  0x7d   : > { %p2626_p3 = pnand %p2624_p1, %p2967_p8 }
  0x7f   : > { %p2627_p11 = pneg %p2626_p3 }
  0x81   : > { %p2632_p13 = pnand %p2630_p12, %p2627_p11 }
  0x83   : > { %2635 = shalt.err (!%p2632_p13)
}
  0x84   : > { %s2636_s26 = scalar_lea.vmem %s469_s19, 2048  ;;  %p2644_p7 = scmp.lt.s32.totalorder %s469_s19, %s469_s19 }
  0x85   : > { %p2637_p0 = scmp.ne.s32.totalorder %s469_s19, %s2636_s26  ;;  %p2645_p9 = scmp.lt.s32.totalorder %s2636_s26, %s2636_s26 }
  0x87   : > { %p2639_p2 = pnand %p2637_p0, %p2967_p8  ;;  %p2646_p5 = por %p2645_p9, %p2644_p7 }
  0x89   : > { %p2640_p4 = pneg %p2639_p2 }
  0x8b   : > { %p2647_p10 = pnand %p2646_p5, %p2640_p4 }
  0x8d   : > { %2650 = shalt.err (!%p2647_p10)
}
  0x8e   : > { %2421 = dma.hbm_to_vmem [thread:$0]  (!%p2951_p6), %s3499_s11, 2048, %s469_s19, [#allocation14], %s2812_s13, %s2812_s13, %s2813_s14  }
  0x8f   : > { %s2017_s10 = sadd.s32 4294967294, %s2807_s18   ;;  %s49_s24 = sadd.s32 1, %s2803_s17 }
  0x90   : > { %s58_s1 = sadd.s32 1, %s2795_s15  ;;  %p51_p8 = scmp.ge.s32.totalorder %s49_s24, 2 }
  0x91   : > { %p65_p1 = scmp.ne.s32.totalorder %s2795_s15, %s2791_s30  ;;  %p66_p3 = scmp.eq.s32.totalorder %s2807_s18, 0 }
  0x92   : > { %p71_p11 = scmp.ne.s32.totalorder %s2791_s30, %s2787_s29  ;;  %s3553_s24 = smov (%p51_p8, %s49_s24), 0 }
  0x93   : > { %p3091_p12 = por %p66_p3, %p65_p1  ;;  %p3527_p13 = scmp.ne.s32.totalorder %s3521_s20, 0 }
  0x94   : > { %s53_s14 = ssub.s32 %s2803_s17, %s3553_s24  ;;  %s3529_s19 = sadd.s32 4294967295, %s2807_s18  }
  0x95   : > { %p3097_p6 = por %p3527_p13, %p71_p11  ;;  %p347_p0 = scmp.eq.s32.totalorder %s3529_s19, 1 }
  0x96   : > { %p56_p2 = scmp.eq.s32.totalorder %s53_s14, 0  ;;  %p353_p4 = scmp.eq.s32.totalorder %s2017_s10, 1 }
  0x97   : > { %p3105_p7 = por %p347_p0, %p65_p1  ;;  %p2438_p9 = scmp.lt.s32.totalorder %s2807_s18, 2 }
  0x98   : > { %s3111_s16 = scalar_select %p56_p2, %s2795_s15, %s58_s1  }
  0x99   : > { %s3530_s6 = scalar_select %p3105_p7, 1, 0 }
  0x9a   : > { %p3113_p5 = por %p353_p4, %p71_p11  ;;  %s485_s25 = sand.u32 1, %s2795_s15  }
  0x9b   : > { %s2025_s27 = sshll.u32 %s485_s25, 5  ;;  %s2049_s12 = sshll.u32 %s2803_s17, 9 }
  0x9c   : > { %s3531_s22 = scalar_select %p3113_p5, 1, 0 }
  0x9d   : > { %s3532_s0 = sld [smem:[#allocation25_spill]]  ;;  %s489_s28 = scalar_lea.vmem [#allocation4], %s2025_s27 }
  0x9e   : > { %s498_s10 = sshll.u32 %s489_s28, 4  ;;  %p3128_p10 = pnand %p2438_p9, %p3091_p12  ;;  %s3124_s10 = int_to_ptr.vmem [resolvable:$true] %s498_s10 }
  0x9f   : > { %s3132_s14 = scalar_lea.sflag [#allocation5], %s485_s25 }
  0xa0   : > { %p2653_p1 = pneg %p3128_p10 }
  0xa3   : > { %s3122_s8 = scalar_lea.hbm %s3532_s0, %s2049_s12  ;;  %s2656_s4 = scalar_lea.hbm %s3532_s0, 1024 }
  0xa4   : > { %s2651_s19 = scalar_lea.hbm %s3122_s8, 512  ;;  %p2657_p12 = scmp.lt.u32.totalorder %s3122_s8, %s3532_s0 }
  0xa5   : > { %p2652_p8 = scmp.ne.s32.totalorder %s3122_s8, %s2651_s19  ;;  %p2658_p13 = scmp.lt.u32.totalorder %s2656_s4, %s2651_s19 }
  0xa6   : > { %p2660_p2 = scmp.lt.u32.totalorder %s2651_s19, %s3122_s8 }
  0xa7   : > { %p2654_p3 = pnand %p2653_p1, %p2652_p8  ;;  %p2659_p0 = por %p2658_p13, %p2657_p12 }
  0xa9   : > { %p2655_p11 = pneg %p2654_p3  ;;  %p2661_p4 = por %p2660_p2, %p2659_p0 }
  0xab   : > { %p2662_p9 = pnand %p2661_p4, %p2655_p11 }
  0xad   : > { %2665 = shalt.err (!%p2662_p9)
}
  0xae   : > { %s2666_s25 = scalar_lea.vmem %s3124_s10, 512  ;;  %s2816_s28 = smov [#allocation4]  }
  0xaf   : > { %p2667_p8 = scmp.ne.s32.totalorder %s3124_s10, %s2666_s25  ;;  %s2671_s27 = sshll.u32 %s2816_s28, 4  ;;  %s2672_s27 = int_to_ptr.vmem [resolvable:$false] %s2671_s27 }
  0xb0   : > { %s2673_s12 = scalar_lea.vmem %s2672_s27, 1024  ;;  %p2674_p7 = scmp.lt.s32.totalorder %s3124_s10, %s2672_s27 }
  0xb1   : > { %p2669_p3 = pnand %p2667_p8, %p2653_p1  ;;  %p2675_p12 = scmp.lt.s32.totalorder %s2673_s12, %s2666_s25 }
  0xb3   : > { %p2670_p5 = pneg %p2669_p3  ;;  %p2676_p13 = por %p2675_p12, %p2674_p7 }
  0xb5   : > { %p2677_p0 = pnand %p2676_p13, %p2670_p5 }
  0xb7   : > { %2680 = shalt.err (!%p2677_p0)
}
  0xb8   : > { %s2817_s19 = smov 256   ;;  %s2818_s4 = smov 16  }
  0xb9   : > { %2425 = dma.hbm_to_vmem [thread:$0]  (!%p3128_p10), %s3122_s8, 512, %s3124_s10, %s3132_s14, %s2817_s19, %s2817_s19, %s2818_s4  }
  0xba   : > { %p3534_p1 = scmp.ne.s32.totalorder %s3522_s21, 0 }
  0xbb   : > { %s3163_s23 = sand.u32 (!%p3534_p1), 1, %s2791_s30  }
  0xbc   : > { %510 = sbr.rel (%p3534_p1) target bundleno = 1427 (0x593), region = 72  ;;  %s2029_s26 = sshll.u32 (!%p3534_p1), %s3163_s23, 5 }
  0xbd   : > { %s513_s25 = scalar_lea.sflag (!%p3534_p1), [#allocation5], %s3163_s23  ;;  %s516_s28 = scalar_lea.vmem (!%p3534_p1), [#allocation4], %s2029_s26 }
  0xc3   : > { %2762 = dma.done.wait (%p3097_p6), %s513_s25, 512  }
  0xc4   : > { %2764 = vsyncadd (%p3097_p6), %s513_s25, 4294966784  ;;  %p3535_p7 = scmp.ne.s32.totalorder %s3521_s20, 0 }
  0xc6   : > { %2766 = dma.done.wait (%p3535_p7), [#allocation8], 2304  }
  0xc7   : > { %2768 = vsyncadd (%p3535_p7), [#allocation8], 4294964992 }
  0xc8   : > { %2770 = dma.done.wait (%p3535_p7), [#allocation11], 4096  }
  0xc9   : > { %2772 = vsyncadd (%p3535_p7), [#allocation11], 4294963200 }
  0xca   : > { %2774 = dma.done.wait (%p3535_p7), [#allocation14], 2048  }
  0xcb   : > { %2776 = vsyncadd (%p3535_p7), [#allocation14], 4294965248  ;;  %vm589_vm0 = vcmask 122880   ;;  %v623_v0 = vlaneseq  ;;  %v2819_v1 = vmov 0.0   ;;  %v3193_v4 = vld [vmem:[%s516_s28] sm:$0xff]  ;;  %v3195_v5 = vld [vmem:[%s516_s28 + $0x8] sm:$0xff] }
  0xcc   : > { %590 = vst.msk [vmem:[#allocation2] sm:$0x1] %vm589_vm0, %v2819_v1  ;;  %591 = vst.msk [vmem:[#allocation3] sm:$0x1] %vm589_vm0, %v2819_v1  ;;  %v3197_v6 = vld [vmem:[%s516_s28 + $0x10] sm:$0xff]  ;;  %v596_v7 = vadd.f32 %v3195_v5, %v3193_v4  ;;  %v3201_v8 = vld [vmem:[%s516_s28 + $0x18] sm:$0xff] }
  0xcd   : > { %v3188_v2 = vshrl.u32 %v623_v0, 7  ;;  %v599_v11 = vadd.f32 %v3201_v8, %v3197_v6  ;;  %v2820_v12 = vmov 0   ;;  %v2821_v13 = vmov 1966171168   ;;  %s3536_s12 = sld [smem:[#allocation27_spill]]  ;;  %s3537_s26 = sld [smem:[#allocation29_spill]] }
  0xce   : > { %597 = vadd.xlane.f32.xlu0 %v596_v7  ;;  %2508 = vset.pattern.permute.xlu1 %v2820_v12  ;;  %v649_v14 = vunpack.c.l.s4 %v2821_v13  ;;  %vm2823_vm1 = vmmov 0   ;;  %vm860_vm2 = vcmask 130112   ;;  %vm1329_vm3 = vcmask 130048   ;;  %s3538_s25 = sld [smem:[#allocation24_spill]]  ;;  %s3539_s21 = sld [smem:[#allocation28_spill]] }
  0xcf   : > { %v3191_v3 = vsub.s32 0, %v3188_v2  ;;  %2507 = vset.pattern.permute.xlu0 %v2820_v12  ;;  %2128 = vmatprep.mubr.msk.f32.mxu0 %vm2823_vm1, %v2819_v1  ;;  %s577_s13 = scalar_lea.vmem [#allocation15], %s3163_s23  ;;  %s3540_s1 = sld [smem:[#allocation30_spill]] }
  0xd0   : > { %v650_v15 = vunpack.c.0.s8 %v649_v14  ;;  %v1326_v14 = vld [vmem:[#allocation7] sm:$0xff]  ;;  %2163 = vmatprep.mubr.msk.f32.mxu1 %vm2823_vm1, %v2819_v1  ;;  %s3541_s19 = sld [smem:[#allocation32_spill]]  ;;  %s1834_s28 = scalar_lea.sflag [#allocation6], %s3163_s23 }
  0xd1   : > { %p3542_p5 = scmp.ne.s32.totalorder %s3530_s6, 0 }
  0xd2   : > { %600 = vadd.xlane.f32.xlu0 %v599_v11  ;;  %v3210_v18 = vsub.s32 %v650_v15, %v3188_v2  ;;  %v1327_v15 = vld [vmem:[#allocation7 + $0x8] sm:$0xff] }
  0xd3   : > { %v3203_v9 = vld [vmem:[#allocation2] sm:$0x1] }
  0xd4   : > { %v626_v10 = vrot.slane %v3203_v9, %v3191_v3  ;;  %s2045_s14 = sshll.u32 %s3538_s25, 4 }
  0xd6   : > { %628 = vbcast.lane.b32.xlu1 %v626_v10, 256  ;;  %s3410_s4 = scalar_lea.hbm %s3541_s19, %s2045_s14 }
  0xda   : > { %632 = vbcast.lane.b32.xlu1 %v626_v10, 264 }
 0x148   : > { %v629_v16 = vpop.permute.xlu1 %628 }
 0x14c   : > { %v633_v25 = vpop.permute.xlu1 %632 }
 0x15b   : > { %v598_v17 = vpop.xlane.xlu0 %597 }
 0x15c   : > { %v3212_v19 = vmul.f32 0.00390625, %v598_v17  ;;  %v2279_v17 = vpack.c.bf16 %v1327_v15, %v1326_v14 }
 0x15e   : > { %v3215_v20 = vsub.f32 %v3212_v19, %v629_v16  ;;  %v2822_v16 = vmov 0.0|0.0  }
 0x15f   : > { %v601_v21 = vpop.xlane.xlu0 %600  ;;  %2278 = vmatprep.subr.bf16.mxu0 %v2822_v16  ;;  %2281 = vmatprep.subr.bf16.mxu1 %v2822_v16 }
 0x160   : > { %v647_v22 = vcombine.high %v3215_v20, %v3215_v20  ;;  %v654_v23 = vrot.slane %v3215_v20, %v3210_v18  ;;  %v3221_v24 = vmul.f32 0.00390625, %v601_v21  ;;  %2280 = vmatpush3.bf16.msra.mxu0 %v2279_v17  ;;  %v604_v21 = vsub.f32 %v3193_v4, %v3212_v19 }
 0x161   : > { %2305 = vmatprep.subr.bf16.mxu0 %v2822_v16 }
 0x162   : > { %v661_v26 = vrot.slane %v647_v22, %v3210_v18  ;;  %v662_v27 = vcombine.high %v654_v23, %v654_v23  ;;  %v3225_v28 = vsub.f32 %v3221_v24, %v633_v25  ;;  %v670_v30 = vrot.slane %v654_v23, %v3210_v18 }
 0x163   : > { %v605_v22 = vsub.f32 %v3195_v5, %v3212_v19  ;;  %v608_v23 = vmul.f32 %v604_v21, %v604_v21 }
 0x164   : > { %v663_v29 = vcombine.high %v661_v26, %v661_v26  ;;  %v684_v31 = vrot.slane %v662_v27, %v3210_v18  ;;  %v696_v32 = vcombine.high %v3225_v28, %v3225_v28  ;;  %v703_v33 = vrot.slane %v3225_v28, %v3210_v18 }
 0x165   : > { %v677_v36 = vrot.slane %v661_v26, %v3210_v18  ;;  %v609_v25 = vmul.f32 %v605_v22, %v605_v22  ;;  %v606_v26 = vsub.f32 %v3197_v6, %v3221_v24  ;;  %v607_v27 = vsub.f32 %v3201_v8, %v3221_v24 }
 0x166   : > { %v691_v34 = vrot.slane %v663_v29, %v3210_v18  ;;  %v745_v35 = vcombine.low %v670_v30, %v684_v31  ;;  %v2035_v37 = vcombine.high %v670_v30, %v684_v31  ;;  %v710_v38 = vrot.slane %v696_v32, %v3210_v18 }
 0x167   : > { %v711_v39 = vcombine.high %v703_v33, %v703_v33  ;;  %v719_v43 = vrot.slane %v703_v33, %v3210_v18  ;;  %v612_v29 = vadd.f32 %v609_v25, %v608_v23  ;;  %v610_v30 = vmul.f32 %v606_v26, %v606_v26 }
 0x168   : > { %v747_v40 = vcombine.low %v677_v36, %v691_v34  ;;  %v2036_v41 = vcombine.high %v677_v36, %v691_v34  ;;  %v712_v42 = vcombine.high %v710_v38, %v710_v38  ;;  %v755_v45 = vrot.slane %v745_v35, %v3210_v18 }
 0x169   : > { %v733_v44 = vrot.slane %v711_v39, %v3210_v18  ;;  %v726_v46 = vrot.slane %v710_v38, %v3210_v18  ;;  %v762_v48 = vrot.slane %v2035_v37, %v3210_v18  ;;  %v611_v31 = vmul.f32 %v607_v27, %v607_v27 }
 0x16a   : > { %v740_v47 = vrot.slane %v712_v42, %v3210_v18  ;;  %v769_v53 = vrot.slane %v747_v40, %v3210_v18  ;;  %v776_v54 = vrot.slane %v2036_v41, %v3210_v18  ;;  %v850_v33 = vand.u32 127, %v623_v0 }
 0x16b   : > { %v794_v49 = vcombine.low %v719_v43, %v733_v44  ;;  %v2037_v50 = vcombine.high %v719_v43, %v733_v44  ;;  %v777_v55 = vcombine.low %v755_v45, %v762_v48  ;;  %v615_v32 = vadd.f32 %v611_v31, %v610_v30 }
 0x16c   : > { %v796_v51 = vcombine.low %v726_v46, %v740_v47  ;;  %v2038_v52 = vcombine.high %v726_v46, %v740_v47  ;;  %v778_v56 = vcombine.low %v769_v53, %v776_v54  ;;  %v855_v4 = vadd.s32 4294967288, %v850_v33 }
 0x16d   : > { %v804_v57 = vrot.slane %v794_v49, %v3210_v18  ;;  %v811_v58 = vrot.slane %v2037_v50, %v3210_v18  ;;  %v785_v60 = vrot.slane %v777_v55, %v3210_v18  ;;  %v3269_v34 = vsub.s32 %v850_v33, %v3188_v2 }
 0x16e   : > { %v818_v59 = vrot.slane %v796_v51, %v3210_v18  ;;  %v792_v61 = vrot.slane %v778_v56, %v3210_v18  ;;  %v825_v62 = vrot.slane %v2038_v52, %v3210_v18  ;;  %v3272_v5 = vsub.s32 %v855_v4, %v3188_v2 }
 0x16f   : > { %v826_v63 = vcombine.low %v804_v57, %v811_v58  ;;  %v1076_v39 = vmul.f32 %v3215_v20, %v3215_v20  ;;  %v1077_v41 = vmul.f32 %v3225_v28, %v3225_v28 }
 0x170   : > { %v793_v7 = vcombine.low %v785_v60, %v792_v61  ;;  %v827_v10 = vcombine.low %v818_v59, %v825_v62  ;;  %v889_v62 = vsub.s32 1, %v3188_v2 }
 0x171   : > { %v834_v11 = vrot.slane %v826_v63, %v3210_v18  ;;  %v1080_v40 = vmul.f32 0.0, %v1076_v39  ;;  %v1081_v43 = vmul.f32 0.0, %v1077_v41  ;;  %v893_v63 = vsub.s32 2, %v3188_v2 }
 0x172   : > { %844 = vperm.xlu0 %2507, %v793_v7   ;;  %v841_v12 = vrot.slane %v827_v10, %v3210_v18  ;;  %v897_v7 = vsub.s32 3, %v3188_v2  ;;  %v901_v10 = vsub.s32 4, %v3188_v2 }
 0x173   : > { %v1084_v42 = vcombine.high %v1080_v40, %v1080_v40  ;;  %v1133_v45 = vcombine.high %v1081_v43, %v1081_v43  ;;  %v1140_v48 = vrot.slane %v1081_v43, %v3210_v18 }
 0x174   : > { %v842_v13 = vcombine.low %v834_v11, %v841_v12  ;;  %v905_v11 = vsub.s32 5, %v3188_v2  ;;  %v909_v12 = vsub.s32 6, %v3188_v2 }
 0x175   : > { %v1098_v44 = vrot.slane %v1084_v42, %v3210_v18  ;;  %v1147_v49 = vrot.slane %v1133_v45, %v3210_v18  ;;  %v1148_v51 = vcombine.high %v1140_v48, %v1140_v48  ;;  %v1156_v58 = vrot.slane %v1140_v48, %v3210_v18 }
 0x176   : > { %847 = vperm.xlu1 %2508, %v842_v13   ;;  %v913_v13 = vsub.s32 7, %v3188_v2 }
 0x177   : > { %v1100_v47 = vcombine.high %v1098_v44, %v1098_v44  ;;  %v1149_v52 = vcombine.high %v1147_v49, %v1147_v49  ;;  %v1114_v53 = vrot.slane %v1098_v44, %v3210_v18  ;;  %v1170_v59 = vrot.slane %v1148_v51, %v3210_v18 }
 0x178   : > { %v1163_v61 = vrot.slane %v1147_v49, %v3210_v18 }
 0x179   : > { %v1128_v20 = vrot.slane %v1100_v47, %v3210_v18  ;;  %v1177_v60 = vrot.slane %v1149_v52, %v3210_v18  ;;  %v1231_v22 = vcombine.low %v1156_v58, %v1170_v59  ;;  %v2041_v23 = vcombine.high %v1156_v58, %v1170_v59 }
 0x17b   : > { %v1184_v56 = vcombine.low %v1114_v53, %v1128_v20  ;;  %v2040_v57 = vcombine.high %v1114_v53, %v1128_v20  ;;  %v1233_v26 = vcombine.low %v1163_v61, %v1177_v60  ;;  %v2042_v27 = vcombine.high %v1163_v61, %v1177_v60 }
 0x17d   : > { %v1206_v17 = vrot.slane %v1184_v56, %v3210_v18  ;;  %v1213_v21 = vrot.slane %v2040_v57, %v3210_v18  ;;  %v1262_v39 = vrot.slane %v2042_v27, %v3210_v18  ;;  %v1405_v27 = vld [vmem:[#allocation9 + $0x8] sm:$0xff] }
 0x19a   : > { %613 = vadd.xlane.f32.xlu1 %v612_v29 }
 0x19e   : > { %616 = vadd.xlane.f32.xlu1 %v615_v32 }
 0x1f1   : > { %v845_v19 = vpop.permute.xlu0 %844 }
 0x1f2   : > { %v854_v8 = vrot.slane %v845_v19, %v3269_v34 }
 0x1f5   : > { %v848_v6 = vpop.permute.xlu1 %847 }
 0x1f6   : > { %v859_v24 = vrot.slane %v848_v6, %v3272_v5 }
 0x1f8   : > { %v861_v35 = vsel %vm860_vm2, %v859_v24, %v854_v8 }
 0x1f9   : > { %v868_v36 = vrot.slane %v861_v35, %v3210_v18  ;;  %v1215_v35 = vcombine.low %v1206_v17, %v1213_v21 }
 0x1fb   : > { %v875_v0 = vrot.slane %v868_v36, %v3210_v18  ;;  %v1229_v60 = vrot.slane %v1215_v35, %v3210_v18  ;;  %v1413_v35 = vld [vmem:[#allocation9 + $0x48] sm:$0xff] }
 0x1fd   : > { %v877_v37 = vadd.f32 %v875_v0, %v3203_v9  ;;  %v1091_v9 = vrot.slane %v1080_v40, %v3210_v18 }
 0x1ff   : > { %879 = vst.msk [vmem:[#allocation2] sm:$0x1] %vm589_vm0, %v877_v37  ;;  %v1099_v46 = vcombine.high %v1091_v9, %v1091_v9  ;;  %v1107_v28 = vrot.slane %v1091_v9, %v3210_v18 }
 0x201   : > { %v1121_v50 = vrot.slane %v1099_v46, %v3210_v18 }
 0x203   : > { %v1182_v54 = vcombine.low %v1107_v28, %v1121_v50  ;;  %v2039_v55 = vcombine.high %v1107_v28, %v1121_v50 }
 0x205   : > { %v1192_v14 = vrot.slane %v1182_v54, %v3210_v18  ;;  %v1199_v15 = vrot.slane %v2039_v55, %v3210_v18  ;;  %v1248_v55 = vrot.slane %v2041_v23, %v3210_v18 }
 0x206   : > { %v1315_v38 = vld [vmem:[#allocation2] sm:$0x1] }
 0x207   : > { %2129 = vmatmul.mubr.msk.f32.vlgmr.msra.gmra.mrb[0].mxu0 %vm1329_vm3, %v1315_v38  ;;  %v1214_v24 = vcombine.low %v1192_v14, %v1199_v15  ;;  %v1255_v38 = vrot.slane %v1233_v26, %v3210_v18  ;;  %v1404_v26 = vld [vmem:[#allocation9] sm:$0xff] }
 0x208   : > { %2198 = vmatprep.mubr.msk.f32.mxu0 %vm2823_vm1, %v2819_v1 }
 0x227   : > { %v614_v25 = vpop.xlane.xlu1 %613 }
 0x228   : > { %v886_v29 = vrot.slane %v614_v25, %v3191_v3  ;;  %v890_v30 = vrot.slane %v614_v25, %v889_v62  ;;  %v894_v31 = vrot.slane %v614_v25, %v893_v63  ;;  %v898_v32 = vrot.slane %v614_v25, %v897_v7 }
 0x229   : > { %v902_v33 = vrot.slane %v614_v25, %v901_v10  ;;  %v906_v2 = vrot.slane %v614_v25, %v905_v11  ;;  %v910_v4 = vrot.slane %v614_v25, %v909_v12  ;;  %v914_v19 = vrot.slane %v614_v25, %v913_v13 }
 0x22a   : > { %v947_v6 = vcombine.low %v886_v29, %v890_v30  ;;  %v948_v8 = vcombine.low %v894_v31, %v898_v32  ;;  %v1406_v29 = vld [vmem:[#allocation9 + $0x10] sm:$0xff]  ;;  %v2282_v30 = vpack.c.bf16 %v1405_v27, %v1404_v26  ;;  %v1407_v31 = vld [vmem:[#allocation9 + $0x18] sm:$0xff] }
 0x22b   : > { %v617_v36 = vpop.xlane.xlu1 %616  ;;  %v949_v0 = vcombine.low %v902_v33, %v906_v2  ;;  %v950_v37 = vcombine.low %v910_v4, %v914_v19  ;;  %v2285_v32 = vpack.c.bf16 %v1407_v31, %v1406_v29  ;;  %v1408_v33 = vld [vmem:[#allocation9 + $0x20] sm:$0xff]  ;;  %v1409_v2 = vld [vmem:[#allocation9 + $0x28] sm:$0xff]  ;;  %v1410_v19 = vld [vmem:[#allocation9 + $0x30] sm:$0xff] }
 0x22c   : > { %v957_v40 = vrot.slane %v947_v6, %v3210_v18  ;;  %v964_v41 = vrot.slane %v948_v8, %v3210_v18  ;;  %v918_v42 = vrot.slane %v617_v36, %v3191_v3  ;;  %v922_v43 = vrot.slane %v617_v36, %v889_v62  ;;  %2283 = vmatpush3.bf16.msra.mxu1 %v2282_v30  ;;  %v1411_v6 = vld [vmem:[#allocation9 + $0x38] sm:$0xff] }
 0x22d   : > { %v971_v9 = vrot.slane %v949_v0, %v3210_v18  ;;  %v978_v44 = vrot.slane %v950_v37, %v3210_v18  ;;  %v926_v45 = vrot.slane %v617_v36, %v893_v63  ;;  %v930_v46 = vrot.slane %v617_v36, %v897_v7  ;;  %2284 = vmatprep.subr.bf16.mxu1 %v2822_v16  ;;  %v1414_v0 = vld [vmem:[#allocation9 + $0x50] sm:$0xff]  ;;  %v1415_v37 = vld [vmem:[#allocation9 + $0x58] sm:$0xff] }
 0x22e   : > { %v979_v47 = vcombine.low %v957_v40, %v964_v41  ;;  %v934_v48 = vrot.slane %v617_v36, %v901_v10  ;;  %v938_v49 = vrot.slane %v617_v36, %v905_v11  ;;  %v942_v50 = vrot.slane %v617_v36, %v909_v12  ;;  %v1417_v40 = vld [vmem:[#allocation9 + $0x68] sm:$0xff] }
 0x22f   : > { %v980_v20 = vcombine.low %v971_v9, %v978_v44  ;;  %v946_v51 = vrot.slane %v617_v36, %v913_v13  ;;  %v996_v52 = vcombine.low %v918_v42, %v922_v43  ;;  %v997_v28 = vcombine.low %v926_v45, %v930_v46  ;;  %v1418_v42 = vld [vmem:[#allocation9 + $0x70] sm:$0xff]  ;;  %v1419_v43 = vld [vmem:[#allocation9 + $0x78] sm:$0xff]  ;;  %v1492_v44 = vld [vmem:[#allocation10] sm:$0xff] }
 0x230   : > { %v987_v53 = vrot.slane %v979_v47, %v3210_v18  ;;  %v998_v54 = vcombine.low %v934_v48, %v938_v49  ;;  %v1241_v3 = vrot.slane %v1231_v22, %v3210_v18  ;;  %v1264_v10 = vcombine.low %v1255_v38, %v1262_v39  ;;  %2286 = vmatpush3.bf16.msra.mxu1 %v2285_v32  ;;  %v1416_v39 = vld [vmem:[#allocation9 + $0x60] sm:$0xff]  ;;  %v1493_v45 = vld [vmem:[#allocation10 + $0x8] sm:$0xff]  ;;  %v1494_v46 = vld [vmem:[#allocation10 + $0x10] sm:$0xff] }
 0x231   : > { %v994_v56 = vrot.slane %v980_v20, %v3210_v18  ;;  %v999_v57 = vcombine.low %v942_v50, %v946_v51  ;;  %v1006_v58 = vrot.slane %v996_v52, %v3210_v18  ;;  %v1013_v59 = vrot.slane %v997_v28, %v3210_v18  ;;  %2287 = vmatprep.subr.bf16.mxu1 %v2822_v16  ;;  %v1495_v48 = vld [vmem:[#allocation10 + $0x18] sm:$0xff]  ;;  %v1496_v50 = vld [vmem:[#allocation10 + $0x20] sm:$0xff]  ;;  %v1497_v20 = vld [vmem:[#allocation10 + $0x28] sm:$0xff] }
 0x232   : > { %v1020_v61 = vrot.slane %v998_v54, %v3210_v18  ;;  %v1222_v11 = vrot.slane %v1214_v24, %v3210_v18  ;;  %v1263_v14 = vcombine.low %v1241_v3, %v1248_v55  ;;  %v1278_v21 = vrot.slane %v1264_v10, %v3210_v18  ;;  %v1412_v24 = vld [vmem:[#allocation9 + $0x40] sm:$0xff]  ;;  %v1498_v52 = vld [vmem:[#allocation10 + $0x30] sm:$0xff]  ;;  %v1499_v28 = vld [vmem:[#allocation10 + $0x38] sm:$0xff] }
 0x233   : > { %v995_v62 = vcombine.low %v987_v53, %v994_v56  ;;  %v1027_v63 = vrot.slane %v999_v57, %v3210_v18  ;;  %v1028_v7 = vcombine.low %v1006_v58, %v1013_v59  ;;  %v2288_v4 = vpack.c.bf16 %v1409_v2, %v1408_v33  ;;  %v1500_v54 = vld [vmem:[#allocation10 + $0x40] sm:$0xff]  ;;  %v1501_v3 = vld [vmem:[#allocation10 + $0x48] sm:$0xff]  ;;  %v1502_v56 = vld [vmem:[#allocation10 + $0x50] sm:$0xff] }
 0x234   : > { %v1230_v15 = vcombine.low %v1222_v11, %v1229_v60  ;;  %v1271_v23 = vrot.slane %v1263_v14, %v3210_v18  ;;  %v2291_v8 = vpack.c.bf16 %v1411_v6, %v1410_v19  ;;  %v2294_v36 = vpack.c.bf16 %v1413_v35, %v1412_v24  ;;  %v1503_v57 = vld [vmem:[#allocation10 + $0x58] sm:$0xff]  ;;  %v1504_v59 = vld [vmem:[#allocation10 + $0x60] sm:$0xff]  ;;  %v1505_v60 = vld [vmem:[#allocation10 + $0x68] sm:$0xff] }
 0x235   : > { %1046 = vperm.xlu0 %2507, %v995_v62   ;;  %v1029_v12 = vcombine.low %v1020_v61, %v1027_v63  ;;  %v1036_v13 = vrot.slane %v1028_v7, %v3210_v18  ;;  %2289 = vmatpush3.bf16.msra.mxu1 %v2288_v4  ;;  %v2297_v38 = vpack.c.bf16 %v1415_v37, %v1414_v0  ;;  %v1579_v32 = vld [vmem:[%s3495_s7] sm:$0xff]  ;;  %v1580_v33 = vld [vmem:[%s3495_s7 + $0x8] sm:$0xff] }
 0x236   : > { %v1279_v25 = vcombine.low %v1271_v23, %v1278_v21  ;;  %2290 = vmatprep.subr.bf16.mxu1 %v2822_v16  ;;  %v2300_v41 = vpack.c.bf16 %v1417_v40, %v1416_v39  ;;  %v2303_v9 = vpack.c.bf16 %v1419_v43, %v1418_v42  ;;  %v2306_v47 = vpack.c.bf16 %v1493_v45, %v1492_v44  ;;  %v880_v21 = vld [vmem:[#allocation3] sm:$0x1]  ;;  %v1506_v37 = vld [vmem:[#allocation10 + $0x70] sm:$0xff]  ;;  %v1420_v40 = vld [vmem:[%s3536_s12] sm:$0x1] }
 0x237   : > { %v1043_v17 = vrot.slane %v1029_v12, %v3210_v18  ;;  %v2309_v49 = vpack.c.bf16 %v1495_v48, %v1494_v46  ;;  %v2312_v51 = vpack.c.bf16 %v1497_v20, %v1496_v50  ;;  %v2315_v53 = vpack.c.bf16 %v1499_v28, %v1498_v52  ;;  %v1657_v42 = vld [vmem:[#allocation12 + $0x8] sm:$0xff]  ;;  %v1659_v48 = vld [vmem:[#allocation12 + $0x18] sm:$0xff] }
 0x238   : > { %2307 = vmatpush3.bf16.msra.mxu0 %v2306_v47  ;;  %v2318_v55 = vpack.c.bf16 %v1501_v3, %v1500_v54  ;;  %v2321_v58 = vpack.c.bf16 %v1503_v57, %v1502_v56  ;;  %v2324_v61 = vpack.c.bf16 %v1505_v60, %v1504_v59  ;;  %v2330_v6 = vpack.c.bf16 %v1580_v33, %v1579_v32  ;;  %v1658_v47 = vld [vmem:[#allocation12 + $0x10] sm:$0xff]  ;;  %v1661_v52 = vld [vmem:[#allocation12 + $0x28] sm:$0xff]  ;;  %v1663_v54 = vld [vmem:[#allocation12 + $0x38] sm:$0xff] }
 0x239   : > { %1281 = vperm.xlu0 %2507, %v1230_v15   ;;  %v1044_v22 = vcombine.low %v1036_v13, %v1043_v17  ;;  %2292 = vmatpush3.bf16.msra.mxu1 %v2291_v8  ;;  %v2336_v20 = vpack.c.bf16 %v1659_v48, %v1658_v47  ;;  %v1665_v56 = vld [vmem:[#allocation12 + $0x48] sm:$0xff]  ;;  %v1668_v60 = vld [vmem:[#allocation12 + $0x60] sm:$0xff]  ;;  %v1754_v33 = vld [vmem:[#allocation13 + $0x50] sm:$0xff] }
 0x23a   : > { %2293 = vmatprep.subr.bf16.mxu1 %v2822_v16  ;;  %2308 = vmatprep.subr.bf16.mxu0 %v2822_v16 }
 0x23b   : > { %1049 = vperm.xlu1 %2508, %v1044_v22  }
 0x23c   : > { %2310 = vmatpush3.bf16.msra.mxu0 %v2309_v49 }
 0x23d   : > { %1284 = vperm.xlu0 %2507, %v1279_v25   ;;  %2295 = vmatpush3.bf16.msra.mxu1 %v2294_v36 }
 0x23e   : > { %2296 = vmatprep.subr.bf16.mxu1 %v2822_v16  ;;  %2311 = vmatprep.subr.bf16.mxu0 %v2822_v16 }
 0x240   : > { %2313 = vmatpush3.bf16.msra.mxu0 %v2312_v51  ;;  %v1660_v51 = vld [vmem:[#allocation12 + $0x20] sm:$0xff] }
 0x241   : > { %2298 = vmatpush3.bf16.msra.mxu1 %v2297_v38  ;;  %2314 = vmatprep.subr.bf16.mxu0 %v2822_v16  ;;  %v1507_v38 = vld [vmem:[#allocation10 + $0x78] sm:$0xff]  ;;  %v2339_v28 = vpack.c.bf16 %v1661_v52, %v1660_v51 }
 0x242   : > { %2299 = vmatprep.subr.bf16.mxu1 %v2822_v16  ;;  %v2327_v39 = vpack.c.bf16 %v1507_v38, %v1506_v37 }
 0x244   : > { %2316 = vmatpush3.bf16.msra.mxu0 %v2315_v53  ;;  %v1662_v53 = vld [vmem:[#allocation12 + $0x30] sm:$0xff] }
 0x245   : > { %2301 = vmatpush3.bf16.msra.mxu1 %v2300_v41  ;;  %2317 = vmatprep.subr.bf16.mxu0 %v2822_v16  ;;  %v1656_v41 = vld [vmem:[#allocation12] sm:$0xff]  ;;  %v2342_v3 = vpack.c.bf16 %v1663_v54, %v1662_v53 }
 0x246   : > { %2302 = vmatprep.subr.bf16.mxu1 %v2822_v16  ;;  %v2333_v45 = vpack.c.bf16 %v1657_v42, %v1656_v41 }
 0x248   : > { %2319 = vmatpush3.bf16.msra.mxu0 %v2318_v55  ;;  %v1664_v55 = vld [vmem:[#allocation12 + $0x40] sm:$0xff] }
 0x249   : > { %2304 = vmatpush3.bf16.msra.mxu1 %v2303_v9  ;;  %2320 = vmatprep.subr.bf16.mxu0 %v2822_v16  ;;  %v2345_v57 = vpack.c.bf16 %v1665_v56, %v1664_v55 }
 0x24a   : > { %2329 = vmatprep.subr.bf16.mxu1 %v2822_v16 }
 0x24c   : > { %2322 = vmatpush3.bf16.msra.mxu0 %v2321_v58  ;;  %v1667_v58 = vld [vmem:[#allocation12 + $0x58] sm:$0xff] }
 0x24d   : > { %2323 = vmatprep.subr.bf16.mxu0 %v2822_v16 }
 0x250   : > { %2325 = vmatpush3.bf16.msra.mxu0 %v2324_v61  ;;  %v1669_v61 = vld [vmem:[#allocation12 + $0x68] sm:$0xff] }
 0x251   : > { %2326 = vmatprep.subr.bf16.mxu0 %v2822_v16 }
 0x254   : > { %2328 = vmatpush3.bf16.msra.mxu0 %v2327_v39 }
 0x255   : > { %2332 = vmatprep.subr.bf16.mxu0 %v2822_v16 }
 0x2b4   : > { %v1047_v62 = vpop.permute.xlu0 %1046 }
 0x2b5   : > { %v1054_v10 = vrot.slane %v1047_v62, %v3269_v34  ;;  %v2351_v62 = vpack.c.bf16 %v1669_v61, %v1668_v60 }
 0x2b8   : > { %v1282_v63 = vpop.permute.xlu0 %1281 }
 0x2b9   : > { %v1289_v13 = vrot.slane %v1282_v63, %v3269_v34  ;;  %v1670_v63 = vld [vmem:[#allocation12 + $0x70] sm:$0xff] }
 0x2ba   : > { %v1050_v7 = vpop.permute.xlu1 %1049 }
 0x2bb   : > { %v1058_v11 = vrot.slane %v1050_v7, %v3272_v5  ;;  %v1671_v7 = vld [vmem:[#allocation12 + $0x78] sm:$0xff] }
 0x2bc   : > { %v1285_v12 = vpop.permute.xlu0 %1284 }
 0x2bd   : > { %v1059_v14 = vsel %vm860_vm2, %v1058_v11, %v1054_v10  ;;  %v1293_v15 = vrot.slane %v1285_v12, %v3272_v5  ;;  %v1328_v5 = vld [vmem:[%s3490_s2] sm:$0x1]  ;;  %v2354_v11 = vpack.c.bf16 %v1671_v7, %v1670_v63 }
 0x2be   : > { %v1066_v17 = vrot.slane %v1059_v14, %v3210_v18  ;;  %v1581_v10 = vld [vmem:[%s3537_s26] sm:$0x1]  ;;  %v1744_v14 = vld [vmem:[#allocation13] sm:$0xff]  ;;  %s1850_s26 = sshll.u32 %s577_s13, 4  ;;  %s1851_s26 = int_to_ptr.vmem [resolvable:$true] %s1850_s26 }
 0x2bf   : > { %v1294_v22 = vsel %vm860_vm2, %v1293_v15, %v1289_v13  ;;  %v1745_v15 = vld [vmem:[#allocation13 + $0x8] sm:$0xff]  ;;  %s2681_s20 = scalar_lea.vmem %s1851_s26, 16 }
 0x2c0   : > { %v1073_v23 = vrot.slane %v1066_v17, %v3210_v18  ;;  %v1301_v25 = vrot.slane %v1294_v22, %v3210_v18  ;;  %v1746_v17 = vld [vmem:[#allocation13 + $0x10] sm:$0xff]  ;;  %v1747_v22 = vld [vmem:[#allocation13 + $0x18] sm:$0xff]  ;;  %p2682_p6 = scmp.ne.s32.totalorder %s1851_s26, %s2681_s20 }
 0x2c2   : > { %v1075_v26 = vadd.f32 %v1073_v23, %v880_v21  ;;  %v1308_v27 = vrot.slane %v1301_v25, %v3210_v18  ;;  %v2357_v21 = vpack.c.bf16 %v1745_v15, %v1744_v14  ;;  %v2360_v23 = vpack.c.bf16 %v1747_v22, %v1746_v17  ;;  %v1748_v25 = vld [vmem:[#allocation13 + $0x20] sm:$0xff]  ;;  %p2683_p10 = pnand %p2682_p6, %p3542_p5 }
 0x2c4   : > { %v1310_v29 = vadd.f32 %v1308_v27, %v1075_v26  ;;  %v1749_v26 = vld [vmem:[#allocation13 + $0x28] sm:$0xff]  ;;  %p2684_p11 = pneg %p2683_p10 }
 0x2c5   : > { %v2363_v27 = vpack.c.bf16 %v1749_v26, %v1748_v25 }
 0x2c6   : > { %1311 = vst.msk [vmem:[#allocation3] sm:$0x1] %vm589_vm0, %v1310_v29  ;;  %v1750_v29 = vld [vmem:[#allocation13 + $0x30] sm:$0xff] }
 0x2cd   : > { %v1316_v34 = vld [vmem:[#allocation3] sm:$0x1] }
 0x2ce   : > { %v1317_v30 = vmul.f32 0.003921569, %v1316_v34  ;;  %v1751_v34 = vld [vmem:[#allocation13 + $0x38] sm:$0xff] }
 0x2d0   : > { %v1318_v31 = vadd.f32 1e-05, %v1317_v30  ;;  %v2366_v30 = vpack.c.bf16 %v1751_v34, %v1750_v29 }
 0x2d2   : > { %2509 = vrsqrt.f32 %v1318_v31  ;;  %vm1321_vm4 = vcmp.eq.f32.partialorder %v1318_v31, inf  ;;  %v1324_v36 = vand.u32 2147483648, %v1318_v31  ;;  %vm1323_vm5 = vcmp.eq.f32.partialorder %v1318_v31, 0.0 }
 0x2da   : > { %v1399_v18 = vpop.f32.mrb[0].mxu0 }
 0x2db   : > { %v1400_v2 = vadd.f32 %v1399_v18, %v1328_v5  ;;  %v2130_v4 = vpop.f32.mrb[1].mxu0  ;;  %v1753_v5 = vld [vmem:[#allocation13 + $0x48] sm:$0xff]  ;;  %v1755_v18 = vld [vmem:[#allocation13 + $0x58] sm:$0xff] }
 0x2dc   : > { %v2510_v19 = vpop.eup %2509  ;;  %v1756_v4 = vld [vmem:[#allocation13 + $0x60] sm:$0xff] }
 0x2dd   : > { %v1403_v8 = vmax.f32 %v1400_v2, 0.0  ;;  %v1320_v24 = vmul.f32 %v2510_v19, %v1318_v31  ;;  %v2372_v2 = vpack.c.bf16 %v1755_v18, %v1754_v33  ;;  %v1757_v19 = vld [vmem:[#allocation13 + $0x68] sm:$0xff] }
 0x2df   : > { %2164 = vmatmul.mubr.f32.vlgmr.msra.gmra.mrb[0].mxu1 %v1403_v8  ;;  %v1322_v35 = vsel %vm1321_vm4, %v1318_v31, %v1320_v24  ;;  %v1752_v31 = vld [vmem:[#allocation13 + $0x40] sm:$0xff]  ;;  %v1758_v8 = vld [vmem:[#allocation13 + $0x70] sm:$0xff]  ;;  %v1759_v24 = vld [vmem:[#allocation13 + $0x78] sm:$0xff] }
 0x2e0   : > { %2331 = vmatpush3.bf16.msra.mxu1 %v2330_v6  ;;  %2205 = vmatprep.mubr.msk.f32.mxu1 %vm2823_vm1, %v2819_v1  ;;  %v1325_v0 = vsel %vm1323_vm5, %v1324_v36, %v1322_v35  ;;  %v2369_v32 = vpack.c.bf16 %v1753_v5, %v1752_v31  ;;  %v2375_v6 = vpack.c.bf16 %v1757_v19, %v1756_v4  ;;  %v1508_v36 = vld [vmem:[%s3539_s21] sm:$0x1]  ;;  %s2824_s21 = smov [#allocation15]  }
 0x2e1   : > { %2356 = vmatprep.subr.bf16.mxu1 %v2822_v16  ;;  %v2378_v35 = vpack.c.bf16 %v1759_v24, %v1758_v8  ;;  %s2685_s8 = sshll.u32 %s2824_s21, 4  ;;  %s2686_s8 = int_to_ptr.vmem [resolvable:$false] %s2685_s8 }
 0x2e2   : > { %s2687_s10 = scalar_lea.vmem %s2686_s8, 32  ;;  %p2688_p2 = scmp.lt.s32.totalorder %s1851_s26, %s2686_s8 }
 0x2e3   : > { %2206 = vmatmul.mubr.msk.f32.vlgmr.msra.gmra.mrb[2].mxu1 %vm1329_vm3, %v1325_v0  ;;  %p2689_p4 = scmp.lt.s32.totalorder %s2687_s10, %s2681_s20 }
 0x2e4   : > { %2275 = vmatprep.mubr.msk.f32.mxu1 %vm2823_vm1, %v2819_v1  ;;  %2358 = vmatpush3.bf16.msra.mxu1 %v2357_v21 }
 0x2e5   : > { %2359 = vmatprep.subr.bf16.mxu1 %v2822_v16  ;;  %p2690_p9 = por %p2689_p4, %p2688_p2 }
 0x2e7   : > { %p2691_p8 = pnand %p2690_p9, %p2684_p11 }
 0x2e8   : > { %2361 = vmatpush3.bf16.msra.mxu1 %v2360_v23 }
 0x2e9   : > { %2362 = vmatprep.subr.bf16.mxu1 %v2822_v16 }
 0x2ec   : > { %2364 = vmatpush3.bf16.msra.mxu1 %v2363_v27 }
 0x2ed   : > { %2365 = vmatprep.subr.bf16.mxu1 %v2822_v16 }
 0x2f0   : > { %2367 = vmatpush3.bf16.msra.mxu1 %v2366_v30 }
 0x2f1   : > { %2368 = vmatprep.subr.bf16.mxu1 %v2822_v16 }
 0x2f4   : > { %2370 = vmatpush3.bf16.msra.mxu1 %v2369_v32 }
 0x2f5   : > { %2371 = vmatprep.subr.bf16.mxu1 %v2822_v16 }
 0x2f8   : > { %2373 = vmatpush3.bf16.msra.mxu1 %v2372_v2 }
 0x2f9   : > { %2374 = vmatprep.subr.bf16.mxu1 %v2822_v16 }
 0x2fc   : > { %2376 = vmatpush3.bf16.msra.mxu1 %v2375_v6 }
 0x2fd   : > { %2377 = vmatprep.subr.bf16.mxu1 %v2822_v16 }
 0x300   : > { %2379 = vmatpush3.bf16.msra.mxu1 %v2378_v35 }
 0x3b2   : > { %v1487_v43 = vpop.f32.mrb[0].mxu1 }
 0x3b3   : > { %v1488_v9 = vadd.f32 %v1487_v43, %v1420_v40  ;;  %v2165_v44 = vpop.f32.mrb[1].mxu1 }
 0x3b5   : > { %v1491_v46 = vmax.f32 %v1488_v9, 0.0 }
 0x3b6   : > { %v1651_v49 = vpop.f32.mrb[2].mxu1 }
 0x3b7   : > { %2199 = vmatmul.mubr.f32.vlgmr.msra.gmra.mrb[2].mxu0 %v1491_v46  ;;  %v2207_v50 = vpop.f32.mrb[3].mxu1  ;;  %v1652_v12 = vadd.f32 %v1651_v49, %v1581_v10 }
 0x3b8   : > { %2334 = vmatpush3.bf16.msra.mxu0 %v2333_v45  ;;  %2240 = vmatprep.mubr.msk.f32.mxu0 %vm2823_vm1, %v2819_v1  ;;  %v1666_v1 = vld [vmem:[#allocation12 + $0x50] sm:$0xff] }
 0x3b9   : > { %2335 = vmatprep.subr.bf16.mxu0 %v2822_v16  ;;  %v2348_v59 = vpack.c.bf16 %v1667_v58, %v1666_v1  ;;  %v1655_v13 = vmax.f32 %v1652_v12, 0.0 }
 0x3bc   : > { %2337 = vmatpush3.bf16.msra.mxu0 %v2336_v20 }
 0x3bd   : > { %2338 = vmatprep.subr.bf16.mxu0 %v2822_v16 }
 0x3c0   : > { %2340 = vmatpush3.bf16.msra.mxu0 %v2339_v28 }
 0x3c1   : > { %2341 = vmatprep.subr.bf16.mxu0 %v2822_v16 }
 0x3c4   : > { %2343 = vmatpush3.bf16.msra.mxu0 %v2342_v3 }
 0x3c5   : > { %2344 = vmatprep.subr.bf16.mxu0 %v2822_v16 }
 0x3c8   : > { %2346 = vmatpush3.bf16.msra.mxu0 %v2345_v57 }
 0x3c9   : > { %2347 = vmatprep.subr.bf16.mxu0 %v2822_v16 }
 0x3cc   : > { %2349 = vmatpush3.bf16.msra.mxu0 %v2348_v59 }
 0x3cd   : > { %2350 = vmatprep.subr.bf16.mxu0 %v2822_v16 }
 0x3d0   : > { %2352 = vmatpush3.bf16.msra.mxu0 %v2351_v62 }
 0x3d1   : > { %2353 = vmatprep.subr.bf16.mxu0 %v2822_v16  ;;  %v1672_v16 = vld [vmem:[%s3540_s1] sm:$0x1] }
 0x3d4   : > { %2355 = vmatpush3.bf16.msra.mxu0 %v2354_v11 }
 0x3d7   : > { %2241 = vmatmul.mubr.f32.vlgmr.msra.gmra.mrb[4].mxu0 %v1655_v13 }
 0x48a   : > { %v1575_v0 = vpop.f32.mrb[2].mxu0 }
 0x48b   : > { %v1576_v37 = vadd.f32 %v1575_v0, %v1508_v36  ;;  %v2200_v38 = vpop.f32.mrb[3].mxu0 }
 0x48d   : > { %1831 = vst [vmem:[%s577_s13] sm:$0x1] %v1576_v37 }
 0x4aa   : > { %v1739_v39 = vpop.f32.mrb[4].mxu0 }
 0x4ab   : > { %v1740_v40 = vadd.f32 %v1739_v39, %v1672_v16  ;;  %v2242_v41 = vpop.f32.mrb[5].mxu0 }
 0x4ad   : > { %v1743_v42 = vmax.f32 %v1740_v40, 0.0 }
 0x4af   : > { %2276 = vmatmul.mubr.f32.vlgmr.msra.gmra.mrb[4].mxu1 %v1743_v42 }
 0x4b0   : > { %2694 = shalt.err (!%p2691_p8)
}
 0x4b1   : > { %s2695_s13 = scalar_lea.hbm %s3410_s4, 16  ;;  %s2699_s12 = scalar_lea.hbm %s3541_s19, 32 }
 0x4b2   : > { %p2696_p3 = scmp.ne.s32.totalorder %s3410_s4, %s2695_s13  ;;  %p2700_p0 = scmp.lt.u32.totalorder %s3410_s4, %s3541_s19 }
 0x4b3   : > { %p2701_p1 = scmp.lt.u32.totalorder %s2699_s12, %s2695_s13  ;;  %p2703_p6 = scmp.lt.u32.totalorder %s2695_s13, %s3410_s4 }
 0x4b4   : > { %p2697_p12 = pnand %p2696_p3, %p3542_p5 }
 0x4b5   : > { %p2702_p7 = por %p2701_p1, %p2700_p0 }
 0x4b6   : > { %p2698_p13 = pneg %p2697_p12 }
 0x4b7   : > { %p2704_p10 = por %p2703_p6, %p2702_p7 }
 0x4b9   : > { %p2705_p11 = pnand %p2704_p10, %p2698_p13 }
 0x4bb   : > { %2708 = shalt.err (!%p2705_p11)
}
 0x4bc   : > { %2402 = dma.vmem_to_hbm [thread:$0]  (%p3542_p5), %s1851_s26, 16, %s3410_s4, %s1834_s28  }
 0x4bd   : > { %s3543_s1 = sld [smem:[#allocation31_spill]]  ;;  %s583_s27 = scalar_lea.vmem [#allocation16], %s3163_s23 }
 0x4be   : > { %s1863_s21 = sshll.u32 %s583_s27, 4  ;;  %s3544_s8 = sld [smem:[#allocation33_spill]]  ;;  %s3441_s21 = int_to_ptr.vmem [resolvable:$true] %s1863_s21 }
 0x4bf   : > { %s1838_s4 = scalar_lea.sflag [#allocation17], %s3163_s23  ;;  %s2709_s26 = scalar_lea.vmem %s3441_s21, 16 }
 0x4c0   : > { %p2710_p2 = scmp.ne.s32.totalorder %s3441_s21, %s2709_s26  ;;  %s2825_s28 = smov [#allocation16]  }
 0x4c1   : > { %s2713_s20 = sshll.u32 %s2825_s28, 4  ;;  %s2714_s20 = int_to_ptr.vmem [resolvable:$false] %s2713_s20 }
 0x4c2   : > { %p2711_p4 = pnand %p2710_p2, %p3542_p5  ;;  %s2715_s25 = scalar_lea.vmem %s2714_s20, 32 }
 0x4c3   : > { %v1760_v43 = vld [vmem:[%s3543_s1] sm:$0x1]  ;;  %p2716_p8 = scmp.lt.s32.totalorder %s3441_s21, %s2714_s20  ;;  %p2717_p3 = scmp.lt.s32.totalorder %s2715_s25, %s2709_s26 }
 0x4c4   : > { %s3439_s0 = scalar_lea.hbm %s3544_s8, %s2045_s14  ;;  %p2712_p9 = pneg %p2711_p4 }
 0x4c5   : > { %p2718_p12 = por %p2717_p3, %p2716_p8 }
 0x4c7   : > { %p2719_p13 = pnand %p2718_p12, %p2712_p9 }
 0x582   : > { %v1827_v9 = vpop.f32.mrb[4].mxu1 }
 0x583   : > { %v1828_v44 = vadd.f32 %v1827_v9, %v1760_v43  ;;  %v2277_v45 = vpop.f32.mrb[5].mxu1 }
 0x585   : > { %1832 = vst [vmem:[%s583_s27] sm:$0x1] %v1828_v44 }
 0x586   : > { %2722 = shalt.err (!%p2719_p13)
}
 0x587   : > { %s2723_s23 = scalar_lea.hbm %s3439_s0, 16  ;;  %s2727_s1 = scalar_lea.hbm %s3544_s8, 32 }
 0x588   : > { %p2724_p0 = scmp.ne.s32.totalorder %s3439_s0, %s2723_s23  ;;  %p2728_p6 = scmp.lt.u32.totalorder %s3439_s0, %s3544_s8 }
 0x589   : > { %p2729_p10 = scmp.lt.u32.totalorder %s2727_s1, %s2723_s23  ;;  %p2731_p2 = scmp.lt.u32.totalorder %s2723_s23, %s3439_s0 }
 0x58a   : > { %p2725_p1 = pnand %p2724_p0, %p3542_p5 }
 0x58b   : > { %p2730_p11 = por %p2729_p10, %p2728_p6 }
 0x58c   : > { %p2726_p7 = pneg %p2725_p1 }
 0x58d   : > { %p2732_p4 = por %p2731_p2, %p2730_p11 }
 0x58f   : > { %p2733_p9 = pnand %p2732_p4, %p2726_p7 }
 0x591   : > { %2736 = shalt.err (!%p2733_p9)
}
 0x592   : > { %2403 = dma.vmem_to_hbm [thread:$0]  (%p3542_p5), %s3441_s21, 16, %s3439_s0, %s1838_s4  }
 0x593 PF: > { %s1875_s12 = sand.u32 1, %s2787_s29   ;;  %p3545_p8 = scmp.ne.s32.totalorder %s3531_s22, 0 }
 0x594   : > { %p3546_p3 = scmp.ge.s32.totalorder %s2807_s18, 2  ;;  %s1876_s26 = scalar_lea.sflag [#allocation6], %s1875_s12 }
 0x596   : > { %p2427_p12 = pnand %p3546_p3, %p3545_p8 }
 0x598   : > { %2778 = dma.done.wait (!%p2427_p12), %s1876_s26, 16  }
 0x599   : > { %2780 = vsyncadd (!%p2427_p12), %s1876_s26, 4294967280  ;;  %s1884_s28 = scalar_lea.sflag [#allocation17], %s1875_s12 }
 0x59a   : > { %2782 = dma.done.wait (!%p2427_p12), %s1884_s28, 16  }
 0x59b   : > { %2784 = vsyncadd (!%p2427_p12), %s1884_s28, 4294967280  ;;  %s37_s18 = sadd.s32 1, %s2807_s18   ;;  %s3547_s29 = smov %s2791_s30 }
 0x59c   : > { %p34_p13 = scmp.ge.s32.totalorder %s37_s18, 4   ;;  %s3548_s30 = smov %s2795_s15 }
 0x59d   : > { %s3549_s15 = smov %s3111_s16  ;;  %s3550_s16 = smov %s2803_s17 }
 0x59e   : > { %s3551_s17 = smov %s3553_s24  ;;  %36 = sbr.rel (!%p34_p13) target bundleno = 21 (0x15), region = 162 }
 0x5a5   :  { %1888 = vsyncpa [#allocation5], 1 }
 0x5a6   :  { %1890 = vsyncpa [#allocation5 + $0x1], 1 }
 0x5a7   :  { %1891 = vsyncpa [#allocation8], 1 }
 0x5a8   :  { %1892 = vsyncpa [#allocation11], 1 }
 0x5a9   :  { %1893 = vsyncpa [#allocation14], 1 }
 0x5aa   :  { %1894 = vsyncpa [#allocation6], 1 }
 0x5ab   :  { %1896 = vsyncpa [#allocation6 + $0x1], 1 }
 0x5ac   :  { %1897 = vsyncpa [#allocation17], 1 }
 0x5ad   :  { %1899 = vsyncpa [#allocation17 + $0x1], 1 }

</bundles_post_ra>
